<compile_context>
chip_gen: v7x
topology: tpu7x:2x2x1
jax: 0.10.0
libtpu: 0.0.40
codegen_flags: <defaults>
</compile_context>

<pallas_src>
import functools

import jax
import jax.numpy as jnp
from jax import lax
from jax.experimental import pallas as pl
from jax.experimental.pallas import tpu as pltpu


def mha_kernel(x_ref, wqkv_ref, bqkv_ref, wo_ref, bo_ref, o_ref, qkv_ref,
               *, seq_len, group_seqs, approx_recip):
    """One grid step: a tile of R = n_seq * seq_len rows of the flattened batch."""
    R, D = x_ref.shape
    HD = wo_ref.shape[0]            # H * head_dim (lane-dense concat width)
    H = HD // D
    S = seq_len
    GR = group_seqs * S             # rows per block-diagonal attention group
    n_groups = R // GR
    cdt = qkv_ref.dtype             # bf16 MXU operand dtype

    # Fused, lane-dense QKV projection for the whole row tile:
    # (R, D) @ (D, 3*H*D), f32 accumulate + f32 bias, stored once as bf16.
    qkv = jnp.dot(x_ref[...], wqkv_ref[...],
                  preferred_element_type=jnp.float32) + bqkv_ref[...]
    qkv_ref[...] = qkv.astype(cdt)

    wo = wo_ref[...]                # hoisted out of the group loop
    bo = bo_ref[...]

    # Block-diagonal bias so sequences grouped into one attention matmul do not
    # attend to each other.  Built once per tile (VPU iota + compare).
    if group_seqs > 1:
        rid = lax.broadcasted_iota(jnp.int32, (GR, GR), 0) // S
        cid = lax.broadcasted_iota(jnp.int32, (GR, GR), 1) // S
        mask_bias = jnp.where(rid == cid, 0.0, -1e30).astype(jnp.float32)

    def attend_group(r0):
        heads = []
        for h in range(H):          # tiny head loop: keep unrolled
            q = qkv_ref[pl.ds(r0, GR), pl.ds(h * D, D)]
            k = qkv_ref[pl.ds(r0, GR), pl.ds((H + h) * D, D)]
            v = qkv_ref[pl.ds(r0, GR), pl.ds((2 * H + h) * D, D)]

            # q @ k^T by contracting the last dims directly (no k transpose);
            # 1/sqrt(S) is already folded into Wq/bq.
            scores = lax.dot_general(
                q, k, dimension_numbers=(((1,), (1,)), ((), ())),
                preferred_element_type=jnp.float32)
            if group_seqs > 1:
                scores = scores + mask_bias

            m = jnp.max(scores, axis=-1, keepdims=True)
            e = jnp.exp(scores - m)
            denom = jnp.sum(e, axis=-1, keepdims=True)
            if approx_recip:
                # EUP reciprocal (~2^-12 rel err): deliberate speed/accuracy trade.
                p = (e * pl.reciprocal(denom, approx=True)).astype(cdt)
            else:
                p = (e / denom).astype(cdt)

            heads.append(
                jnp.dot(p, v, preferred_element_type=jnp.float32).astype(cdt))

        # All H heads assembled into ONE lane-dense (GR, H*D) register tile that
        # feeds the fused output projection directly (no per-head 32-lane
        # masked stores, no intermediate slab in VMEM).
        cat = jnp.concatenate(heads, axis=-1)
        out = jnp.dot(cat, wo, preferred_element_type=jnp.float32) + bo
        o_ref[pl.ds(r0, GR), :] = out.astype(o_ref.dtype)

    if n_groups == 1:
        attend_group(0)
    else:
        # fori_loop (not a statically unrolled Python loop) bounds live ranges
        # per group and keeps bundle-stream size / vreg pressure small.
        def body(grp, carry):
            attend_group(pl.multiple_of(grp * GR, GR))
            return carry
        lax.fori_loop(0, n_groups, body, 0)


def _pick_block_b(B, S, D, HD, out_itemsize, *,
                  target_rows=1024, vmem_budget=24 * 1024 * 1024):
    """Largest batch tile whose VMEM footprint fits the budget, keeps >= 2 grid
    steps (megacore / v7x sharding) and satisfies the (8,128) sublane rule."""
    def vmem_est(rows):
        weights = 2 * (D * 3 * HD * 2 + 3 * HD * 4 + HD * D * 2 + D * 4)
        return (2 * rows * D * 2               # x tile (bf16, double buffered)
                + 2 * rows * D * out_itemsize  # out tile (double buffered)
                + rows * 3 * HD * 2            # qkv scratch (bf16)
                + rows * 3 * HD * 4            # transient f32 qkv value
                + weights)

    divisors = [bb for bb in range(1, B + 1) if B % bb == 0]

    def valid(bb, need_two_steps, need_target):
        rows = bb * S
        if rows % 8 != 0 and bb != B:          # (8,128) rule unless full-array block
            return False
        if need_two_steps and B >= 2 and B // bb < 2:
            return False
        if need_target and rows > target_rows:
            return False
        return vmem_est(rows) <= vmem_budget

    for two_steps, cap in ((True, True), (True, False), (False, True), (False, False)):
        cands = [bb for bb in divisors if valid(bb, two_steps, cap)]
        if cands:
            return max(cands)
    return 1


def multi_head_attention(x, wq, bq, wk, bk, wv, bv, wo, bo, *,
                         compute_dtype=jnp.bfloat16, block_b=None,
                         approx_recip=True):
    """Pallas forward of the PyTorch MultiHeadAttention module.

    x: (B, S, D); wq/wk/wv: (H, D, D) (already transposed so y = x @ W + b);
    bq/bk/bv: (H, 1, D); wo: (H*D, D); bo: (1, D).
    """
    B, S, D = x.shape
    H = wq.shape[0]
    HD = H * D
    assert wo.shape == (HD, D)
    out_dtype = x.dtype

    # --- one-time weight prep (wrapper side, plain XLA) ----------------------
    # torch scale = q.size(1) ** 0.5 == sqrt(seq_len); folded into Wq/bq (in
    # f32, then one bf16 round of the scaled weights) so the kernel never
    # scales scores.
    scale = jnp.float32(S) ** 0.5

    def fold_w(w):   # (H, Din, Dout) -> (Din, H*Dout), head-major columns
        return jnp.transpose(w, (1, 0, 2)).reshape(D, HD)

    def fold_b(b):   # (H, 1, Dout) -> (1, H*Dout)
        return jnp.transpose(b, (1, 0, 2)).reshape(1, HD)

    wqkv = jnp.concatenate([fold_w(wq) / scale, fold_w(wk), fold_w(wv)], axis=1)
    bqkv = jnp.concatenate([fold_b(bq) / scale, fold_b(bk), fold_b(bv)], axis=1)

    wqkv = wqkv.astype(compute_dtype)            # bf16 MXU operands
    wo_c = wo.astype(compute_dtype)
    bqkv = bqkv.astype(jnp.float32)              # biases added on f32 accumulators
    bo_c = bo.astype(jnp.float32)
    x2 = x.astype(compute_dtype).reshape(B * S, D)

    # --- tiling ---------------------------------------------------------------
    if block_b is None:
        block_b = _pick_block_b(B, S, D, HD, jnp.dtype(out_dtype).itemsize)
    assert B % block_b == 0
    rows = block_b * S
    assert rows % 8 == 0 or block_b == B, (
        "row tile must satisfy the (8,128) sublane rule")
    grid = (B // block_b,)

    # Block-diagonal grouping: batch g sequences into one (g*S)-row attention
    # matmul per head (good MXU shapes for small S); g == 1 degenerates to plain
    # per-sequence attention for long sequences.
    g = 1 if S >= 128 else max(1, min(block_b, 128 // S))
    while block_b % g:
        g -= 1

    three_hd = 3 * HD

    def build(single_buffer_weights):
        wkw = dict(pipeline_mode=pl.Buffered(1)) if single_buffer_weights else {}
        return pl.pallas_call(
            functools.partial(mha_kernel, seq_len=S, group_seqs=g,
                              approx_recip=approx_recip),
            out_shape=jax.ShapeDtypeStruct((B * S, D), out_dtype),
            grid=grid,
            in_specs=[
                pl.BlockSpec((rows, D), lambda i: (i, 0)),             # x row tile
                # Resident weights (constant index map).  Single-buffered when
                # supported: they never change across grid steps.
                pl.BlockSpec((D, three_hd), lambda i: (0, 0), **wkw),  # Wqkv
                pl.BlockSpec((1, three_hd), lambda i: (0, 0), **wkw),  # bqkv
                pl.BlockSpec((HD, D), lambda i: (0, 0), **wkw),        # Wo
                pl.BlockSpec((1, D), lambda i: (0, 0), **wkw),         # bo
            ],
            out_specs=pl.BlockSpec((rows, D), lambda i: (i, 0)),
            scratch_shapes=[pltpu.VMEM((rows, three_hd), compute_dtype)],  # qkv
            compiler_params=pltpu.CompilerParams(
                dimension_semantics=("parallel",),
                vmem_limit_bytes=32 * 1024 * 1024),
        )

    args = (x2, wqkv, bqkv, wo_c, bo_c)
    try:
        out = build(True)(*args)        # single-buffered resident weights
    except Exception:
        # pl.Buffered(1) not supported by this jax version for pallas_call:
        # fall back to the default double-buffered weight specs.
        out = build(False)(*args)
    return out.reshape(B, S, D)


def reference(x, wq, bq, wk, bk, wv, bv, wo, bo):
    """Pure-JAX f32 reference mirroring the PyTorch forward."""
    B, S, D = x.shape
    H = wq.shape[0]
    scale = jnp.float32(S) ** 0.5
    heads = []
    for h in range(H):
        q = x @ wq[h] + bq[h]
        k = x @ wk[h] + bk[h]
        v = x @ wv[h] + bv[h]
        scores = jnp.einsum("bqd,bkd->bqk", q, k) / scale
        p = jax.nn.softmax(scores, axis=-1)
        heads.append(jnp.einsum("bqk,bkd->bqd", p, v))
    s = jnp.concatenate(heads, axis=-1)
    return s @ wo + bo


def _make_inputs(key, B, S, D, H):
    keys = jax.random.split(key, 9)
    x  = jax.random.normal(keys[0], (B, S, D), dtype=jnp.float32)
    wq = jax.random.normal(keys[1], (H, D, D), dtype=jnp.float32) * 0.1
    bq = jax.random.normal(keys[2], (H, 1, D), dtype=jnp.float32) * 0.1
    wk = jax.random.normal(keys[3], (H, D, D), dtype=jnp.float32) * 0.1
    bk = jax.random.normal(keys[4], (H, 1, D), dtype=jnp.float32) * 0.1
    wv = jax.random.normal(keys[5], (H, D, D), dtype=jnp.float32) * 0.1
    bv = jax.random.normal(keys[6], (H, 1, D), dtype=jnp.float32) * 0.1
    wo = jax.random.normal(keys[7], (H * D, D), dtype=jnp.float32) * 0.1
    bo = jax.random.normal(keys[8], (1, D), dtype=jnp.float32) * 0.1
    return x, wq, bq, wk, bk, wv, bv, wo, bo


if __name__ == "__main__":
    key = jax.random.PRNGKey(0)
    k0, k1 = jax.random.split(key)

    # Case 1: module-scale shapes (B=2, S=8, D=32, H=4) -> per-sequence path.
    # Case 2: larger batch -> exercises the fori_loop + block-diagonal grouped
    #         attention path (g > 1, multiple groups per tile).
    for sub_key, (B, S, D, H) in ((k0, (2, 8, 32, 4)), (k1, (64, 8, 32, 4))):
        args = _make_inputs(sub_key, B, S, D, H)
        out = multi_head_attention(*args)
        out = jax.block_until_ready(out)

        ref = reference(*args)
        assert out.shape == (B, S, D)
        max_err = float(jnp.max(jnp.abs(out - ref)))
        # bf16 matmul operands (f32 accumulation) + approx reciprocal ->
        # loosened tolerance vs the f32 reference.
        assert jnp.allclose(out, ref, atol=5e-2, rtol=5e-2), (
            f"mismatch vs reference at B={B},S={S},D={D},H={H} "
            f"(max abs err {max_err})")

    print("KERNEL_OK")
</pallas_src>

<mosaic_0001>
module attributes {stable_mosaic.version = 11 : i64} {
  func.func @mha_kernel(%arg0: i32, %arg1: memref<8x32xbf16, #tpu.memory_space<vmem>>, %arg2: memref<32x384xbf16, #tpu.memory_space<vmem>>, %arg3: memref<1x384xf32, #tpu.memory_space<vmem>>, %arg4: memref<128x32xbf16, #tpu.memory_space<vmem>>, %arg5: memref<1x32xf32, #tpu.memory_space<vmem>>, %arg6: memref<8x32xf32, #tpu.memory_space<vmem>>, %arg7: memref<8x384xbf16, #tpu.memory_space<vmem>>) attributes {dimension_semantics = [#tpu.dimension_semantics<parallel>], iteration_bounds = array<i64: 2>, scalar_prefetch = 0 : i64, scratch_operands = 1 : i64, tpu.core_type = #tpu.core_type<tc>, window_params = [{transform_indices = @transform_0, window_bounds = array<i64: 8, 32>}, {pipeline_mode = #tpu.pipeline_mode<synchronous>, transform_indices = @transform_1, window_bounds = array<i64: 32, 384>}, {pipeline_mode = #tpu.pipeline_mode<synchronous>, transform_indices = @transform_2, window_bounds = array<i64: 1, 384>}, {pipeline_mode = #tpu.pipeline_mode<synchronous>, transform_indices = @transform_3, window_bounds = array<i64: 128, 32>}, {pipeline_mode = #tpu.pipeline_mode<synchronous>, transform_indices = @transform_4, window_bounds = array<i64: 1, 32>}, {transform_indices = @transform_5, window_bounds = array<i64: 8, 32>}]} {
    %c0 = arith.constant 0 : index
    %c0_0 = arith.constant 0 : index
    %0 = vector.load %arg1[%c0, %c0_0] : memref<8x32xbf16, #tpu.memory_space<vmem>>, vector<8x32xbf16>
    %c0_1 = arith.constant 0 : index
    %c0_2 = arith.constant 0 : index
    %1 = vector.load %arg2[%c0_1, %c0_2] : memref<32x384xbf16, #tpu.memory_space<vmem>>, vector<32x384xbf16>
    %cst = arith.constant dense<0.000000e+00> : vector<8x384xf32>
    %2 = tpu.matmul %0, %1, %cst {dimension_numbers = #tpu.dot_dimension_numbers<[1], [0], [0], [1], [0, 0, 1, 1], [], []>} : vector<8x32xbf16>, vector<32x384xbf16>, vector<8x384xf32> -> vector<8x384xf32>
    %c0_3 = arith.constant 0 : index
    %c0_4 = arith.constant 0 : index
    %3 = vector.load %arg3[%c0_3, %c0_4] : memref<1x384xf32, #tpu.memory_space<vmem>>, vector<1x384xf32>
    %4 = vector.broadcast %3 : vector<1x384xf32> to vector<8x384xf32>
    %5 = arith.addf %2, %4 : vector<8x384xf32>
    %6 = arith.truncf %5 : vector<8x384xf32> to vector<8x384xbf16>
    %c0_5 = arith.constant 0 : index
    %c0_6 = arith.constant 0 : index
    %7 = vector.load %arg7[%c0_5, %c0_6] : memref<8x384xbf16, #tpu.memory_space<vmem>>, vector<8x384xbf16>
    tpu.vector_store %arg7[%c0_5, %c0_6], %6 {strides = array<i32>} : memref<8x384xbf16, #tpu.memory_space<vmem>>, vector<8x384xbf16>,
    %c0_7 = arith.constant 0 : index
    %c0_8 = arith.constant 0 : index
    %8 = vector.load %arg4[%c0_7, %c0_8] : memref<128x32xbf16, #tpu.memory_space<vmem>>, vector<128x32xbf16>
    %c0_9 = arith.constant 0 : index
    %c0_10 = arith.constant 0 : index
    %9 = vector.load %arg5[%c0_9, %c0_10] : memref<1x32xf32, #tpu.memory_space<vmem>>, vector<1x32xf32>
    %c0_11 = arith.constant 0 : index
    %c0_12 = arith.constant 0 : index
    %10 = vector.load %arg7[%c0_11, %c0_12] : memref<8x384xbf16, #tpu.memory_space<vmem>>, vector<8x32xbf16>
    %c0_13 = arith.constant 0 : index
    %c128 = arith.constant 128 : index
    %11 = vector.load %arg7[%c0_13, %c128] : memref<8x384xbf16, #tpu.memory_space<vmem>>, vector<8x32xbf16>
    %c0_14 = arith.constant 0 : index
    %c256 = arith.constant 256 : index
    %12 = vector.load %arg7[%c0_14, %c256] : memref<8x384xbf16, #tpu.memory_space<vmem>>, vector<8x32xbf16>
    %cst_15 = arith.constant dense<0.000000e+00> : vector<8x8xf32>
    %13 = tpu.matmul %10, %11, %cst_15 {dimension_numbers = #tpu.dot_dimension_numbers<[1], [1], [0], [0], [0, 0, 1, 0], [], []>} : vector<8x32xbf16>, vector<8x32xbf16>, vector<8x8xf32> -> vector<8x8xf32>
    %cst_16 = arith.constant dense<0xFF800000> : vector<8xf32>
    %14 = vector.multi_reduction <maximumf>, %13, %cst_16 [1] : vector<8x8xf32> to vector<8xf32>
    %15 = vector.shape_cast %14 : vector<8xf32> to vector<8x1xf32>
    %16 = vector.broadcast %15 : vector<8x1xf32> to vector<8x8xf32>
    %17 = arith.subf %13, %16 : vector<8x8xf32>
    %18 = math.exp %17 : vector<8x8xf32>
    %cst_17 = arith.constant dense<0.000000e+00> : vector<8xf32>
    %19 = vector.multi_reduction <add>, %18, %cst_17 [1] : vector<8x8xf32> to vector<8xf32>
    %20 = vector.shape_cast %19 : vector<8xf32> to vector<8x1xf32>
    %21 = tpu.reciprocal %20 {approx = true} : vector<8x1xf32> -> vector<8x1xf32>
    %22 = vector.broadcast %21 : vector<8x1xf32> to vector<8x8xf32>
    %23 = arith.mulf %18, %22 : vector<8x8xf32>
    %24 = arith.truncf %23 : vector<8x8xf32> to vector<8x8xbf16>
    %cst_18 = arith.constant dense<0.000000e+00> : vector<8x32xf32>
    %25 = tpu.matmul %24, %12, %cst_18 {dimension_numbers = #tpu.dot_dimension_numbers<[1], [0], [0], [1], [0, 0, 1, 1], [], []>} : vector<8x8xbf16>, vector<8x32xbf16>, vector<8x32xf32> -> vector<8x32xf32>
    %26 = arith.truncf %25 : vector<8x32xf32> to vector<8x32xbf16>
    %c0_19 = arith.constant 0 : index
    %c32 = arith.constant 32 : index
    %27 = vector.load %arg7[%c0_19, %c32] : memref<8x384xbf16, #tpu.memory_space<vmem>>, vector<8x32xbf16>
    %c0_20 = arith.constant 0 : index
    %c160 = arith.constant 160 : index
    %28 = vector.load %arg7[%c0_20, %c160] : memref<8x384xbf16, #tpu.memory_space<vmem>>, vector<8x32xbf16>
    %c0_21 = arith.constant 0 : index
    %c288 = arith.constant 288 : index
    %29 = vector.load %arg7[%c0_21, %c288] : memref<8x384xbf16, #tpu.memory_space<vmem>>, vector<8x32xbf16>
    %cst_22 = arith.constant dense<0.000000e+00> : vector<8x8xf32>
    %30 = tpu.matmul %27, %28, %cst_22 {dimension_numbers = #tpu.dot_dimension_numbers<[1], [1], [0], [0], [0, 0, 1, 0], [], []>} : vector<8x32xbf16>, vector<8x32xbf16>, vector<8x8xf32> -> vector<8x8xf32>
    %cst_23 = arith.constant dense<0xFF800000> : vector<8xf32>
    %31 = vector.multi_reduction <maximumf>, %30, %cst_23 [1] : vector<8x8xf32> to vector<8xf32>
    %32 = vector.shape_cast %31 : vector<8xf32> to vector<8x1xf32>
    %33 = vector.broadcast %32 : vector<8x1xf32> to vector<8x8xf32>
    %34 = arith.subf %30, %33 : vector<8x8xf32>
    %35 = math.exp %34 : vector<8x8xf32>
    %cst_24 = arith.constant dense<0.000000e+00> : vector<8xf32>
    %36 = vector.multi_reduction <add>, %35, %cst_24 [1] : vector<8x8xf32> to vector<8xf32>
    %37 = vector.shape_cast %36 : vector<8xf32> to vector<8x1xf32>
    %38 = tpu.reciprocal %37 {approx = true} : vector<8x1xf32> -> vector<8x1xf32>
    %39 = vector.broadcast %38 : vector<8x1xf32> to vector<8x8xf32>
    %40 = arith.mulf %35, %39 : vector<8x8xf32>
    %41 = arith.truncf %40 : vector<8x8xf32> to vector<8x8xbf16>
    %cst_25 = arith.constant dense<0.000000e+00> : vector<8x32xf32>
    %42 = tpu.matmul %41, %29, %cst_25 {dimension_numbers = #tpu.dot_dimension_numbers<[1], [0], [0], [1], [0, 0, 1, 1], [], []>} : vector<8x8xbf16>, vector<8x32xbf16>, vector<8x32xf32> -> vector<8x32xf32>
    %43 = arith.truncf %42 : vector<8x32xf32> to vector<8x32xbf16>
    %c0_26 = arith.constant 0 : index
    %c64 = arith.constant 64 : index
    %44 = vector.load %arg7[%c0_26, %c64] : memref<8x384xbf16, #tpu.memory_space<vmem>>, vector<8x32xbf16>
    %c0_27 = arith.constant 0 : index
    %c192 = arith.constant 192 : index
    %45 = vector.load %arg7[%c0_27, %c192] : memref<8x384xbf16, #tpu.memory_space<vmem>>, vector<8x32xbf16>
    %c0_28 = arith.constant 0 : index
    %c320 = arith.constant 320 : index
    %46 = vector.load %arg7[%c0_28, %c320] : memref<8x384xbf16, #tpu.memory_space<vmem>>, vector<8x32xbf16>
    %cst_29 = arith.constant dense<0.000000e+00> : vector<8x8xf32>
    %47 = tpu.matmul %44, %45, %cst_29 {dimension_numbers = #tpu.dot_dimension_numbers<[1], [1], [0], [0], [0, 0, 1, 0], [], []>} : vector<8x32xbf16>, vector<8x32xbf16>, vector<8x8xf32> -> vector<8x8xf32>
    %cst_30 = arith.constant dense<0xFF800000> : vector<8xf32>
    %48 = vector.multi_reduction <maximumf>, %47, %cst_30 [1] : vector<8x8xf32> to vector<8xf32>
    %49 = vector.shape_cast %48 : vector<8xf32> to vector<8x1xf32>
    %50 = vector.broadcast %49 : vector<8x1xf32> to vector<8x8xf32>
    %51 = arith.subf %47, %50 : vector<8x8xf32>
    %52 = math.exp %51 : vector<8x8xf32>
    %cst_31 = arith.constant dense<0.000000e+00> : vector<8xf32>
    %53 = vector.multi_reduction <add>, %52, %cst_31 [1] : vector<8x8xf32> to vector<8xf32>
    %54 = vector.shape_cast %53 : vector<8xf32> to vector<8x1xf32>
    %55 = tpu.reciprocal %54 {approx = true} : vector<8x1xf32> -> vector<8x1xf32>
    %56 = vector.broadcast %55 : vector<8x1xf32> to vector<8x8xf32>
    %57 = arith.mulf %52, %56 : vector<8x8xf32>
    %58 = arith.truncf %57 : vector<8x8xf32> to vector<8x8xbf16>
    %cst_32 = arith.constant dense<0.000000e+00> : vector<8x32xf32>
    %59 = tpu.matmul %58, %46, %cst_32 {dimension_numbers = #tpu.dot_dimension_numbers<[1], [0], [0], [1], [0, 0, 1, 1], [], []>} : vector<8x8xbf16>, vector<8x32xbf16>, vector<8x32xf32> -> vector<8x32xf32>
    %60 = arith.truncf %59 : vector<8x32xf32> to vector<8x32xbf16>
    %c0_33 = arith.constant 0 : index
    %c96 = arith.constant 96 : index
    %61 = vector.load %arg7[%c0_33, %c96] : memref<8x384xbf16, #tpu.memory_space<vmem>>, vector<8x32xbf16>
    %c0_34 = arith.constant 0 : index
    %c224 = arith.constant 224 : index
    %62 = vector.load %arg7[%c0_34, %c224] : memref<8x384xbf16, #tpu.memory_space<vmem>>, vector<8x32xbf16>
    %c0_35 = arith.constant 0 : index
    %c352 = arith.constant 352 : index
    %63 = vector.load %arg7[%c0_35, %c352] : memref<8x384xbf16, #tpu.memory_space<vmem>>, vector<8x32xbf16>
    %cst_36 = arith.constant dense<0.000000e+00> : vector<8x8xf32>
    %64 = tpu.matmul %61, %62, %cst_36 {dimension_numbers = #tpu.dot_dimension_numbers<[1], [1], [0], [0], [0, 0, 1, 0], [], []>} : vector<8x32xbf16>, vector<8x32xbf16>, vector<8x8xf32> -> vector<8x8xf32>
    %cst_37 = arith.constant dense<0xFF800000> : vector<8xf32>
    %65 = vector.multi_reduction <maximumf>, %64, %cst_37 [1] : vector<8x8xf32> to vector<8xf32>
    %66 = vector.shape_cast %65 : vector<8xf32> to vector<8x1xf32>
    %67 = vector.broadcast %66 : vector<8x1xf32> to vector<8x8xf32>
    %68 = arith.subf %64, %67 : vector<8x8xf32>
    %69 = math.exp %68 : vector<8x8xf32>
    %cst_38 = arith.constant dense<0.000000e+00> : vector<8xf32>
    %70 = vector.multi_reduction <add>, %69, %cst_38 [1] : vector<8x8xf32> to vector<8xf32>
    %71 = vector.shape_cast %70 : vector<8xf32> to vector<8x1xf32>
    %72 = tpu.reciprocal %71 {approx = true} : vector<8x1xf32> -> vector<8x1xf32>
    %73 = vector.broadcast %72 : vector<8x1xf32> to vector<8x8xf32>
    %74 = arith.mulf %69, %73 : vector<8x8xf32>
    %75 = arith.truncf %74 : vector<8x8xf32> to vector<8x8xbf16>
    %cst_39 = arith.constant dense<0.000000e+00> : vector<8x32xf32>
    %76 = tpu.matmul %75, %63, %cst_39 {dimension_numbers = #tpu.dot_dimension_numbers<[1], [0], [0], [1], [0, 0, 1, 1], [], []>} : vector<8x8xbf16>, vector<8x32xbf16>, vector<8x32xf32> -> vector<8x32xf32>
    %77 = arith.truncf %76 : vector<8x32xf32> to vector<8x32xbf16>
    %78 = tpu.concatenate %26, %43, %60, %77 in 1 : vector<8x32xbf16>, vector<8x32xbf16>, vector<8x32xbf16>, vector<8x32xbf16> -> vector<8x128xbf16>
    %cst_40 = arith.constant dense<0.000000e+00> : vector<8x32xf32>
    %79 = tpu.matmul %78, %8, %cst_40 {dimension_numbers = #tpu.dot_dimension_numbers<[1], [0], [0], [1], [0, 0, 1, 1], [], []>} : vector<8x128xbf16>, vector<128x32xbf16>, vector<8x32xf32> -> vector<8x32xf32>
    %80 = vector.broadcast %9 : vector<1x32xf32> to vector<8x32xf32>
    %81 = arith.addf %79, %80 : vector<8x32xf32>
    %c0_41 = arith.constant 0 : index
    %c0_42 = arith.constant 0 : index
    %82 = vector.load %arg6[%c0_41, %c0_42] : memref<8x32xf32, #tpu.memory_space<vmem>>, vector<8x32xf32>
    tpu.vector_store %arg6[%c0_41, %c0_42], %81 {strides = array<i32>} : memref<8x32xf32, #tpu.memory_space<vmem>>, vector<8x32xf32>,
    return
  }
  func.func @transform_0(%arg0: i32) -> (i32, i32) {
    %c0_i32 = arith.constant 0 : i32
    %c0_i32_0 = arith.constant 0 : i32
    return %arg0, %c0_i32 : i32, i32
  }
  func.func @transform_1(%arg0: i32) -> (i32, i32) {
    %c0_i32 = arith.constant 0 : i32
    %c0_i32_0 = arith.constant 0 : i32
    %c0_i32_1 = arith.constant 0 : i32
    return %c0_i32, %c0_i32_0 : i32, i32
  }
  func.func @transform_2(%arg0: i32) -> (i32, i32) {
    %c0_i32 = arith.constant 0 : i32
    %c0_i32_0 = arith.constant 0 : i32
    %c0_i32_1 = arith.constant 0 : i32
    return %c0_i32, %c0_i32_0 : i32, i32
  }
  func.func @transform_3(%arg0: i32) -> (i32, i32) {
    %c0_i32 = arith.constant 0 : i32
    %c0_i32_0 = arith.constant 0 : i32
    %c0_i32_1 = arith.constant 0 : i32
    return %c0_i32, %c0_i32_0 : i32, i32
  }
  func.func @transform_4(%arg0: i32) -> (i32, i32) {
    %c0_i32 = arith.constant 0 : i32
    %c0_i32_0 = arith.constant 0 : i32
    %c0_i32_1 = arith.constant 0 : i32
    return %c0_i32, %c0_i32_0 : i32, i32
  }
  func.func @transform_5(%arg0: i32) -> (i32, i32) {
    %c0_i32 = arith.constant 0 : i32
    %c0_i32_0 = arith.constant 0 : i32
    return %arg0, %c0_i32 : i32, i32
  }
}

module attributes {stable_mosaic.version = 11 : i64} {
  func.func @mha_kernel(%arg0: i32, %arg1: memref<8x32xbf16, #tpu.memory_space<vmem>>, %arg2: memref<32x384xbf16, #tpu.memory_space<vmem>>, %arg3: memref<1x384xf32, #tpu.memory_space<vmem>>, %arg4: memref<128x32xbf16, #tpu.memory_space<vmem>>, %arg5: memref<1x32xf32, #tpu.memory_space<vmem>>, %arg6: memref<8x32xf32, #tpu.memory_space<vmem>>, %arg7: memref<8x384xbf16, #tpu.memory_space<vmem>>) attributes {dimension_semantics = [#tpu.dimension_semantics<parallel>], iteration_bounds = array<i64: 2>, scalar_prefetch = 0 : i64, scratch_operands = 1 : i64, tpu.core_type = #tpu.core_type<tc>, window_params = [{transform_indices = @transform_0, window_bounds = array<i64: 8, 32>}, {pipeline_mode = #tpu.pipeline_mode<synchronous>, transform_indices = @transform_1, window_bounds = array<i64: 32, 384>}, {pipeline_mode = #tpu.pipeline_mode<synchronous>, transform_indices = @transform_2, window_bounds = array<i64: 1, 384>}, {pipeline_mode = #tpu.pipeline_mode<synchronous>, transform_indices = @transform_3, window_bounds = array<i64: 128, 32>}, {pipeline_mode = #tpu.pipeline_mode<synchronous>, transform_indices = @transform_4, window_bounds = array<i64: 1, 32>}, {transform_indices = @transform_5, window_bounds = array<i64: 8, 32>}]} {
    %c0 = arith.constant 0 : index
    %c0_0 = arith.constant 0 : index
    %0 = vector.load %arg1[%c0, %c0_0] : memref<8x32xbf16, #tpu.memory_space<vmem>>, vector<8x32xbf16>
    %c0_1 = arith.constant 0 : index
    %c0_2 = arith.constant 0 : index
    %1 = vector.load %arg2[%c0_1, %c0_2] : memref<32x384xbf16, #tpu.memory_space<vmem>>, vector<32x384xbf16>
    %cst = arith.constant dense<0.000000e+00> : vector<8x384xf32>
    %2 = tpu.matmul %0, %1, %cst {dimension_numbers = #tpu.dot_dimension_numbers<[1], [0], [0], [1], [0, 0, 1, 1], [], []>} : vector<8x32xbf16>, vector<32x384xbf16>, vector<8x384xf32> -> vector<8x384xf32>
    %c0_3 = arith.constant 0 : index
    %c0_4 = arith.constant 0 : index
    %3 = vector.load %arg3[%c0_3, %c0_4] : memref<1x384xf32, #tpu.memory_space<vmem>>, vector<1x384xf32>
    %4 = vector.broadcast %3 : vector<1x384xf32> to vector<8x384xf32>
    %5 = arith.addf %2, %4 : vector<8x384xf32>
    %6 = arith.truncf %5 : vector<8x384xf32> to vector<8x384xbf16>
    %c0_5 = arith.constant 0 : index
    %c0_6 = arith.constant 0 : index
    %7 = vector.load %arg7[%c0_5, %c0_6] : memref<8x384xbf16, #tpu.memory_space<vmem>>, vector<8x384xbf16>
    tpu.vector_store %arg7[%c0_5, %c0_6], %6 {strides = array<i32>} : memref<8x384xbf16, #tpu.memory_space<vmem>>, vector<8x384xbf16>,
    %c0_7 = arith.constant 0 : index
    %c0_8 = arith.constant 0 : index
    %8 = vector.load %arg4[%c0_7, %c0_8] : memref<128x32xbf16, #tpu.memory_space<vmem>>, vector<128x32xbf16>
    %c0_9 = arith.constant 0 : index
    %c0_10 = arith.constant 0 : index
    %9 = vector.load %arg5[%c0_9, %c0_10] : memref<1x32xf32, #tpu.memory_space<vmem>>, vector<1x32xf32>
    %c0_11 = arith.constant 0 : index
    %c0_12 = arith.constant 0 : index
    %10 = vector.load %arg7[%c0_11, %c0_12] : memref<8x384xbf16, #tpu.memory_space<vmem>>, vector<8x32xbf16>
    %c0_13 = arith.constant 0 : index
    %c128 = arith.constant 128 : index
    %11 = vector.load %arg7[%c0_13, %c128] : memref<8x384xbf16, #tpu.memory_space<vmem>>, vector<8x32xbf16>
    %c0_14 = arith.constant 0 : index
    %c256 = arith.constant 256 : index
    %12 = vector.load %arg7[%c0_14, %c256] : memref<8x384xbf16, #tpu.memory_space<vmem>>, vector<8x32xbf16>
    %cst_15 = arith.constant dense<0.000000e+00> : vector<8x8xf32>
    %13 = tpu.matmul %10, %11, %cst_15 {dimension_numbers = #tpu.dot_dimension_numbers<[1], [1], [0], [0], [0, 0, 1, 0], [], []>} : vector<8x32xbf16>, vector<8x32xbf16>, vector<8x8xf32> -> vector<8x8xf32>
    %cst_16 = arith.constant dense<0xFF800000> : vector<8xf32>
    %14 = vector.multi_reduction <maximumf>, %13, %cst_16 [1] : vector<8x8xf32> to vector<8xf32>
    %15 = vector.shape_cast %14 : vector<8xf32> to vector<8x1xf32>
    %16 = vector.broadcast %15 : vector<8x1xf32> to vector<8x8xf32>
    %17 = arith.subf %13, %16 : vector<8x8xf32>
    %18 = math.exp %17 : vector<8x8xf32>
    %cst_17 = arith.constant dense<0.000000e+00> : vector<8xf32>
    %19 = vector.multi_reduction <add>, %18, %cst_17 [1] : vector<8x8xf32> to vector<8xf32>
    %20 = vector.shape_cast %19 : vector<8xf32> to vector<8x1xf32>
    %21 = tpu.reciprocal %20 {approx = true} : vector<8x1xf32> -> vector<8x1xf32>
    %22 = vector.broadcast %21 : vector<8x1xf32> to vector<8x8xf32>
    %23 = arith.mulf %18, %22 : vector<8x8xf32>
    %24 = arith.truncf %23 : vector<8x8xf32> to vector<8x8xbf16>
    %cst_18 = arith.constant dense<0.000000e+00> : vector<8x32xf32>
    %25 = tpu.matmul %24, %12, %cst_18 {dimension_numbers = #tpu.dot_dimension_numbers<[1], [0], [0], [1], [0, 0, 1, 1], [], []>} : vector<8x8xbf16>, vector<8x32xbf16>, vector<8x32xf32> -> vector<8x32xf32>
    %26 = arith.truncf %25 : vector<8x32xf32> to vector<8x32xbf16>
    %c0_19 = arith.constant 0 : index
    %c32 = arith.constant 32 : index
    %27 = vector.load %arg7[%c0_19, %c32] : memref<8x384xbf16, #tpu.memory_space<vmem>>, vector<8x32xbf16>
    %c0_20 = arith.constant 0 : index
    %c160 = arith.constant 160 : index
    %28 = vector.load %arg7[%c0_20, %c160] : memref<8x384xbf16, #tpu.memory_space<vmem>>, vector<8x32xbf16>
    %c0_21 = arith.constant 0 : index
    %c288 = arith.constant 288 : index
    %29 = vector.load %arg7[%c0_21, %c288] : memref<8x384xbf16, #tpu.memory_space<vmem>>, vector<8x32xbf16>
    %cst_22 = arith.constant dense<0.000000e+00> : vector<8x8xf32>
    %30 = tpu.matmul %27, %28, %cst_22 {dimension_numbers = #tpu.dot_dimension_numbers<[1], [1], [0], [0], [0, 0, 1, 0], [], []>} : vector<8x32xbf16>, vector<8x32xbf16>, vector<8x8xf32> -> vector<8x8xf32>
    %cst_23 = arith.constant dense<0xFF800000> : vector<8xf32>
    %31 = vector.multi_reduction <maximumf>, %30, %cst_23 [1] : vector<8x8xf32> to vector<8xf32>
    %32 = vector.shape_cast %31 : vector<8xf32> to vector<8x1xf32>
    %33 = vector.broadcast %32 : vector<8x1xf32> to vector<8x8xf32>
    %34 = arith.subf %30, %33 : vector<8x8xf32>
    %35 = math.exp %34 : vector<8x8xf32>
    %cst_24 = arith.constant dense<0.000000e+00> : vector<8xf32>
    %36 = vector.multi_reduction <add>, %35, %cst_24 [1] : vector<8x8xf32> to vector<8xf32>
    %37 = vector.shape_cast %36 : vector<8xf32> to vector<8x1xf32>
    %38 = tpu.reciprocal %37 {approx = true} : vector<8x1xf32> -> vector<8x1xf32>
    %39 = vector.broadcast %38 : vector<8x1xf32> to vector<8x8xf32>
    %40 = arith.mulf %35, %39 : vector<8x8xf32>
    %41 = arith.truncf %40 : vector<8x8xf32> to vector<8x8xbf16>
    %cst_25 = arith.constant dense<0.000000e+00> : vector<8x32xf32>
    %42 = tpu.matmul %41, %29, %cst_25 {dimension_numbers = #tpu.dot_dimension_numbers<[1], [0], [0], [1], [0, 0, 1, 1], [], []>} : vector<8x8xbf16>, vector<8x32xbf16>, vector<8x32xf32> -> vector<8x32xf32>
    %43 = arith.truncf %42 : vector<8x32xf32> to vector<8x32xbf16>
    %c0_26 = arith.constant 0 : index
    %c64 = arith.constant 64 : index
    %44 = vector.load %arg7[%c0_26, %c64] : memref<8x384xbf16, #tpu.memory_space<vmem>>, vector<8x32xbf16>
    %c0_27 = arith.constant 0 : index
    %c192 = arith.constant 192 : index
    %45 = vector.load %arg7[%c0_27, %c192] : memref<8x384xbf16, #tpu.memory_space<vmem>>, vector<8x32xbf16>
    %c0_28 = arith.constant 0 : index
    %c320 = arith.constant 320 : index
    %46 = vector.load %arg7[%c0_28, %c320] : memref<8x384xbf16, #tpu.memory_space<vmem>>, vector<8x32xbf16>
    %cst_29 = arith.constant dense<0.000000e+00> : vector<8x8xf32>
    %47 = tpu.matmul %44, %45, %cst_29 {dimension_numbers = #tpu.dot_dimension_numbers<[1], [1], [0], [0], [0, 0, 1, 0], [], []>} : vector<8x32xbf16>, vector<8x32xbf16>, vector<8x8xf32> -> vector<8x8xf32>
    %cst_30 = arith.constant dense<0xFF800000> : vector<8xf32>
    %48 = vector.multi_reduction <maximumf>, %47, %cst_30 [1] : vector<8x8xf32> to vector<8xf32>
    %49 = vector.shape_cast %48 : vector<8xf32> to vector<8x1xf32>
    %50 = vector.broadcast %49 : vector<8x1xf32> to vector<8x8xf32>
    %51 = arith.subf %47, %50 : vector<8x8xf32>
    %52 = math.exp %51 : vector<8x8xf32>
    %cst_31 = arith.constant dense<0.000000e+00> : vector<8xf32>
    %53 = vector.multi_reduction <add>, %52, %cst_31 [1] : vector<8x8xf32> to vector<8xf32>
    %54 = vector.shape_cast %53 : vector<8xf32> to vector<8x1xf32>
    %55 = tpu.reciprocal %54 {approx = true} : vector<8x1xf32> -> vector<8x1xf32>
    %56 = vector.broadcast %55 : vector<8x1xf32> to vector<8x8xf32>
    %57 = arith.mulf %52, %56 : vector<8x8xf32>
    %58 = arith.truncf %57 : vector<8x8xf32> to vector<8x8xbf16>
    %cst_32 = arith.constant dense<0.000000e+00> : vector<8x32xf32>
    %59 = tpu.matmul %58, %46, %cst_32 {dimension_numbers = #tpu.dot_dimension_numbers<[1], [0], [0], [1], [0, 0, 1, 1], [], []>} : vector<8x8xbf16>, vector<8x32xbf16>, vector<8x32xf32> -> vector<8x32xf32>
    %60 = arith.truncf %59 : vector<8x32xf32> to vector<8x32xbf16>
    %c0_33 = arith.constant 0 : index
    %c96 = arith.constant 96 : index
    %61 = vector.load %arg7[%c0_33, %c96] : memref<8x384xbf16, #tpu.memory_space<vmem>>, vector<8x32xbf16>
    %c0_34 = arith.constant 0 : index
    %c224 = arith.constant 224 : index
    %62 = vector.load %arg7[%c0_34, %c224] : memref<8x384xbf16, #tpu.memory_space<vmem>>, vector<8x32xbf16>
    %c0_35 = arith.constant 0 : index
    %c352 = arith.constant 352 : index
    %63 = vector.load %arg7[%c0_35, %c352] : memref<8x384xbf16, #tpu.memory_space<vmem>>, vector<8x32xbf16>
    %cst_36 = arith.constant dense<0.000000e+00> : vector<8x8xf32>
    %64 = tpu.matmul %61, %62, %cst_36 {dimension_numbers = #tpu.dot_dimension_numbers<[1], [1], [0], [0], [0, 0, 1, 0], [], []>} : vector<8x32xbf16>, vector<8x32xbf16>, vector<8x8xf32> -> vector<8x8xf32>
    %cst_37 = arith.constant dense<0xFF800000> : vector<8xf32>
    %65 = vector.multi_reduction <maximumf>, %64, %cst_37 [1] : vector<8x8xf32> to vector<8xf32>
    %66 = vector.shape_cast %65 : vector<8xf32> to vector<8x1xf32>
    %67 = vector.broadcast %66 : vector<8x1xf32> to vector<8x8xf32>
    %68 = arith.subf %64, %67 : vector<8x8xf32>
    %69 = math.exp %68 : vector<8x8xf32>
    %cst_38 = arith.constant dense<0.000000e+00> : vector<8xf32>
    %70 = vector.multi_reduction <add>, %69, %cst_38 [1] : vector<8x8xf32> to vector<8xf32>
    %71 = vector.shape_cast %70 : vector<8xf32> to vector<8x1xf32>
    %72 = tpu.reciprocal %71 {approx = true} : vector<8x1xf32> -> vector<8x1xf32>
    %73 = vector.broadcast %72 : vector<8x1xf32> to vector<8x8xf32>
    %74 = arith.mulf %69, %73 : vector<8x8xf32>
    %75 = arith.truncf %74 : vector<8x8xf32> to vector<8x8xbf16>
    %cst_39 = arith.constant dense<0.000000e+00> : vector<8x32xf32>
    %76 = tpu.matmul %75, %63, %cst_39 {dimension_numbers = #tpu.dot_dimension_numbers<[1], [0], [0], [1], [0, 0, 1, 1], [], []>} : vector<8x8xbf16>, vector<8x32xbf16>, vector<8x32xf32> -> vector<8x32xf32>
    %77 = arith.truncf %76 : vector<8x32xf32> to vector<8x32xbf16>
    %78 = tpu.concatenate %26, %43, %60, %77 in 1 : vector<8x32xbf16>, vector<8x32xbf16>, vector<8x32xbf16>, vector<8x32xbf16> -> vector<8x128xbf16>
    %cst_40 = arith.constant dense<0.000000e+00> : vector<8x32xf32>
    %79 = tpu.matmul %78, %8, %cst_40 {dimension_numbers = #tpu.dot_dimension_numbers<[1], [0], [0], [1], [0, 0, 1, 1], [], []>} : vector<8x128xbf16>, vector<128x32xbf16>, vector<8x32xf32> -> vector<8x32xf32>
    %80 = vector.broadcast %9 : vector<1x32xf32> to vector<8x32xf32>
    %81 = arith.addf %79, %80 : vector<8x32xf32>
    %c0_41 = arith.constant 0 : index
    %c0_42 = arith.constant 0 : index
    %82 = vector.load %arg6[%c0_41, %c0_42] : memref<8x32xf32, #tpu.memory_space<vmem>>, vector<8x32xf32>
    tpu.vector_store %arg6[%c0_41, %c0_42], %81 {strides = array<i32>} : memref<8x32xf32, #tpu.memory_space<vmem>>, vector<8x32xf32>,
    return
  }
  func.func @transform_0(%arg0: i32) -> (i32, i32) {
    %c0_i32 = arith.constant 0 : i32
    %c0_i32_0 = arith.constant 0 : i32
    return %arg0, %c0_i32 : i32, i32
  }
  func.func @transform_1(%arg0: i32) -> (i32, i32) {
    %c0_i32 = arith.constant 0 : i32
    %c0_i32_0 = arith.constant 0 : i32
    %c0_i32_1 = arith.constant 0 : i32
    return %c0_i32, %c0_i32_0 : i32, i32
  }
  func.func @transform_2(%arg0: i32) -> (i32, i32) {
    %c0_i32 = arith.constant 0 : i32
    %c0_i32_0 = arith.constant 0 : i32
    %c0_i32_1 = arith.constant 0 : i32
    return %c0_i32, %c0_i32_0 : i32, i32
  }
  func.func @transform_3(%arg0: i32) -> (i32, i32) {
    %c0_i32 = arith.constant 0 : i32
    %c0_i32_0 = arith.constant 0 : i32
    %c0_i32_1 = arith.constant 0 : i32
    return %c0_i32, %c0_i32_0 : i32, i32
  }
  func.func @transform_4(%arg0: i32) -> (i32, i32) {
    %c0_i32 = arith.constant 0 : i32
    %c0_i32_0 = arith.constant 0 : i32
    %c0_i32_1 = arith.constant 0 : i32
    return %c0_i32, %c0_i32_0 : i32, i32
  }
  func.func @transform_5(%arg0: i32) -> (i32, i32) {
    %c0_i32 = arith.constant 0 : i32
    %c0_i32_0 = arith.constant 0 : i32
    return %arg0, %c0_i32 : i32, i32
  }
}

</mosaic_0001>

<bundles_post_ra>
// kernel: tpu_custom_call.1
= control target key start
LH: loop header
LB: loop body
LE: loop exit
PB: predicated region body
PF: predicated region fallthrough
CT: control target
= control target key end

     0   :  { %10 = vsyncpa [#allocation4], 0  ;;  %s1588_s0 = inlined_call_operand.vmem [shape: bf16[16,32], index: 0, kind: input, shape index: {}]   ;;  %s1589_s1 = inlined_call_operand.vmem [shape: bf16[32,384], index: 1, kind: input, shape index: {}]   ;;  %s1590_s2 = inlined_call_operand.vmem [shape: f32[1,384], index: 2, kind: input, shape index: {}]   ;;  %s1591_s3 = inlined_call_operand.vmem [shape: bf16[128,32], index: 3, kind: input, shape index: {}]   ;;  %s1592_s4 = inlined_call_operand.vmem [shape: f32[1,32], index: 4, kind: input, shape index: {}]   ;;  %s1593_s5 = inlined_call_operand.hbm [shape: f32[16,32], index: 5, kind: output, shape index: {}]  }
   0x1   :  { %12 = vsyncpa [#allocation4 + $0x1], 0  ;;  %s1362_s18 = smov 0   ;;  %s1364_s19 = smov 0  }
   0x2   :  { %s1366_s20 = smov 0   ;;  %s1368_s21 = smov 0  }
   0x3 LB: > { %s1383_s22 = sadd.s32 4294967295, %s1323_s21   ;;  %s1035_s23 = sadd.s32 4294967294, %s1323_s21   ;;  %s1323_s21 = sphi %s1368_s21, %s1599_s21   ;;  %s1319_s20 = sphi %s1366_s20, %s1598_s20   ;;  %s1315_s19 = sphi %s1364_s19, %s1597_s19   ;;  %s1311_s18 = sphi %s1362_s18, %s1596_s18  }
   0x4   : > { %s1387_s24 = sadd.s32 1, %s1323_s21   ;;  %s135_s25 = sadd.s32 1, %s1319_s20 }
   0x5   : > { %s132_s26 = ssub.s32 %s1323_s21, %s1387_s24  ;;  %p145_p0 = scmp.ne.s32.totalorder %s1319_s20, %s1315_s19 }
   0x6   : > { %p133_p1 = scmp.eq.s32.totalorder %s132_s26, 0  ;;  %p146_p2 = scmp.eq.s32.totalorder %s1383_s22, 1 }
   0x7   : > { %p151_p3 = scmp.ne.s32.totalorder %s1315_s19, %s1311_s18  ;;  %p152_p4 = scmp.eq.s32.totalorder %s1035_s23, 1 }
   0x8   : > { %s1398_s27 = scalar_select %p133_p1, %s1319_s20, %s135_s25  }
   0x9   : > { %p1400_p5 = por %p146_p2, %p145_p0  ;;  %p1404_p6 = por %p152_p4, %p151_p3 }
   0xa   : > { %p1038_p7 = scmp.ge.s32.totalorder %s1323_s21, 1  ;;  %p189_p8 = scmp.lt.s32.totalorder %s1323_s21, 3 }
   0xc   : > { %p190_p9 = pnand %p1038_p7, %p189_p8 }
   0xd   : > { %v1226_v0 = vld [vmem:[%s1589_s1 + $0x4] ss:$12 sps:$4 sm:$0xff] (!%p190_p9)   ;;  %p216_p10 = scmp.lt.s32.totalorder (!%p190_p9), %s1383_s22, 1  ;;  %v1228_v1 = vld [vmem:[%s1589_s1] ss:$12 sps:$4 sm:$0xff] (!%p190_p9)   ;;  %v1325_v2 = vmov (!%p190_p9), 0   ;;  %v232_v9 = vlaneseq (!%p190_p9) }
   0xe   : > { %193 = sbr.rel (%p190_p9) target bundleno = 1479 (0x5c7), region = 40  ;;  %315 = vmatprep.mubr.bf16.mxu1 (!%p190_p9), %v1325_v2  ;;  %283 = vmatprep.subr.bf16.mxu1 (!%p190_p9), %v1226_v0  ;;  %v1229_v3 = vld [vmem:[%s1589_s1 + $0x1c] ss:$12 sps:$4 sm:$0xff] (!%p190_p9)   ;;  %v1231_v4 = vld [vmem:[%s1589_s1 + $0x18] ss:$12 sps:$4 sm:$0xff] (!%p190_p9)   ;;  %vm279_vm0 = vcmask (!%p190_p9), 261120  }
   0xf   : > { %284 = vmatpush1.bf16.msra.mxu1 (!%p190_p9), %v1228_v1  ;;  %v1232_v6 = vld [vmem:[%s1589_s1 + $0x8] ss:$12 sps:$4 sm:$0xff] (!%p190_p9)   ;;  %v1326_v7 = vmov (!%p190_p9), 0.0   ;;  %v1233_v8 = vld [vmem:[%s1589_s1 + $0x20] ss:$12 sps:$4 sm:$0xff] (!%p190_p9)   ;;  %vm1327_vm1 = vmmov (!%p190_p9), 0  }
  0x10   : > { %285 = vmatprep.subr.bf16.mxu1 (!%p190_p9), %v1229_v3  ;;  %1125 = vmatprep.subr.bf16.mxu0 (!%p190_p9), %v1326_v7  ;;  %v233_v10 = vshrl.u32 (!%p190_p9), %v232_v9, 7  ;;  %v230_v12 = vld [vmem:[%s1590_s2] sm:$0x7] (!%p190_p9)  ;;  %s1328_s8 = smov (!%p190_p9), 64   ;;  %s1329_s9 = smov (!%p190_p9), 96   ;;  %vm461_vm2 = vcmask (!%p190_p9), 1043456  }
  0x11   : > { %1127 = vmatprep.mubr.msk.bf16.mxu0 (!%p190_p9), %vm1327_vm1, %v1326_v7  ;;  %s1330_s10 = smov (!%p190_p9), 32   ;;  %vm445_vm3 = vcmask (!%p190_p9), 64512   ;;  %vm860_vm4 = vcmask (!%p190_p9), 523264   ;;  %vm863_vm5 = vcmask (!%p190_p9), 785408   ;;  %s1331_s6 = smov (!%p190_p9), [#allocation3]  }
  0x12   : > { %v234_v11 = vsub.s32 (!%p190_p9), 0, %v233_v10  ;;  %v238_v13 = vsub.s32 (!%p190_p9), 1, %v233_v10  ;;  %v242_v28 = vsub.s32 (!%p190_p9), 2, %v233_v10  ;;  %s1265_s7 = sshll.u32 (!%p190_p9), %s1331_s6, 4  ;;  %s1266_s7 = int_to_ptr.vmem [resolvable:$false] %s1265_s7 }
  0x13   : > { %286 = vmatpush1.bf16.msra.mxu1 (!%p190_p9), %v1231_v4 }
  0x14   : > { %1105 = vmatprep.subr.bf16.mxu1 (!%p190_p9), %v1326_v7  ;;  %v235_v14 = vrot.slane (!%p190_p9), %v230_v12, %v234_v11  ;;  %v239_v15 = vrot.slane (!%p190_p9), %v230_v12, %v238_v13  ;;  %v243_v29 = vrot.slane (!%p190_p9), %v230_v12, %v242_v28 }
  0x15   : > { %s217_s11 = scalar_select %p216_p10, %s1383_s22, 1 }
  0x17   : > { %s1040_s14 = sshll.u32 %s217_s11, 2  ;;  %s1267_s11 = scalar_lea.vmem %s1266_s7, 256 }
  0x18   : > { %s219_s17 = scalar_lea.vmem %s1588_s0, %s1040_s14 }
  0x19   : > { %v221_v5 = vld [vmem:[%s219_s17] sm:$0xf] }
  0x1a   : > { %1047 = vmatmul.mubr.msk.bf16.vlgmr.msra.gmra.mrb[0].mxu1 %vm279_vm0, %v221_v5 }
  0x1b   : > { %1106 = vmatpush3.bf16.msra.mxu1 %v1232_v6  ;;  %1109 = vmatprep.mubr.msk.bf16.mxu1 %vm1327_vm1, %v1326_v7 }
  0x1c   : > { %1107 = vmatprep.subr.bf16.mxu1 %v1326_v7 }
  0x1f   : > { %1108 = vmatpush3.bf16.msra.mxu1 %v1233_v8 }
  0x20   : > { %1113 = vmatprep.subr.bf16.mxu1 %v1326_v7 }
  0x22   : > { %1110 = vmatmul.mubr.msk.bf16.vlgmr.msra.gmra.mrb[4].mxu1 %vm279_vm0, %v221_v5 }
  0x23   : > { %1115 = vmatprep.mubr.msk.bf16.mxu1 %vm1327_vm1, %v1326_v7 }
  0xed   : > { %v317_v16 = vpop.f32.mrb[0].mxu1 }
  0xee   : > { %v318_v17 = vadd.f32 %v317_v16, %v235_v14  ;;  %v319_v18 = vpop.f32.mrb[1].mxu1 }
  0xef   : > { %v320_v19 = vadd.f32 %v319_v18, %v239_v15  ;;  %v321_v20 = vpop.f32.mrb[2].mxu1 }
  0xf0   : > { %v322_v21 = vpop.f32.mrb[3].mxu1 }
  0xf1   : > { %v1075_v22 = vpack.c.bf16 %v320_v19, %v318_v17 }
  0xf3   : > { %377 = vst [vmem:[#allocation2] sm:$0xff] %v1075_v22 }
  0xf5   : > { %v358_v30 = vpop.f32.mrb[4].mxu1 }
  0xf6   : > { %v359_v31 = vadd.f32 %v358_v30, %v243_v29  ;;  %v1111_v32 = vpop.f32.mrb[5].mxu1 }
  0xf7   : > { %v361_v33 = vpop.f32.mrb[6].mxu1 }
  0xf8   : > { %v1076_v34 = vpack.c.bf16 %v359_v31, %v359_v31  ;;  %v1112_v35 = vpop.f32.mrb[7].mxu1 }
  0xfa   : > { %v397_v23 = vld [vmem:[#allocation2 + $0x4] sm:$0xf]  ;;  %v396_v26 = vld [vmem:[#allocation2] sm:$0xf]  ;;  %378 = vst [vmem:[#allocation2 + $0x8] sm:$0xf] %v1076_v34 }
  0xfb   : > { %v403_v24 = vsel %vm279_vm0, %v397_v23, 0  ;;  %v1054_v25 = vcombine.low %v397_v23, %v397_v23  ;;  %v1053_v27 = vcombine.low %v396_v26, %v396_v26 }
  0xfc   : > { %1114 = vmatpush3.bf16.xpose.msra.mxu1 %v403_v24 }
  0xfd   : > { %628 = vrot.lane.b32.xlu1 %v1054_v25, %s1328_s8  ;;  %514 = vrot.lane.b32.xlu0 %v1054_v25, %s1329_s9 }
  0xfe   : > { %1119 = vmatprep.subr.bf16.mxu1 %v1326_v7 }
 0x101   : > { %626 = vrot.lane.b32.xlu1 %v1053_v27, %s1328_s8  ;;  %509 = vrot.lane.b32.xlu0 %v1053_v27, %s1329_s9  ;;  %v398_v36 = vld [vmem:[#allocation2 + $0x8] sm:$0xf] }
 0x102   : > { %v463_v37 = vsel %vm461_vm2, %v398_v36, 0  ;;  %v1056_v9 = vcombine.low %v398_v36, %v398_v36 }
 0x103   : > { %1116 = vmatmul.mubr.msk.bf16.vlgmr.msra.gmra.mrb[8].mxu1 %vm279_vm0, %v396_v26 }
 0x104   : > { %1121 = vmatprep.mubr.msk.bf16.mxu1 %vm1327_vm1, %v1326_v7  ;;  %1120 = vmatpush3.bf16.msra.mxu1 %v463_v37 }
 0x105   : > { %737 = vrot.lane.b32.xlu1 %v1053_v27, %s1330_s10  ;;  %739 = vrot.lane.b32.xlu0 %v1054_v25, %s1330_s10 }
 0x106   : > { %1131 = vmatprep.subr.bf16.mxu1 %v1326_v7 }
 0x16f   : > { %v515_v38 = vpop.permute.xlu0 %514  ;;  %v629_v40 = vpop.permute.xlu1 %628 }
 0x170   : > { %v520_v39 = vsel %vm279_vm0, %v515_v38, 0  ;;  %v634_v42 = vsel %vm279_vm0, %v629_v40, 0 }
 0x171   : > { %1126 = vmatpush3.bf16.xpose.msra.mxu0 %v520_v39 }
 0x172   : > { %1137 = vmatprep.subr.bf16.mxu0 %v1326_v7 }
 0x173   : > { %v510_v41 = vpop.permute.xlu0 %509  ;;  %v627_v44 = vpop.permute.xlu1 %626 }
 0x177   : > { %v740_v43 = vpop.permute.xlu0 %739  ;;  %v738_v46 = vpop.permute.xlu1 %737 }
 0x178   : > { %1128 = vmatmul.mubr.msk.bf16.vlgmr.msra.gmra.mrb[0].mxu0 %vm279_vm0, %v510_v41  ;;  %v745_v45 = vsel %vm279_vm0, %v740_v43, 0 }
 0x179   : > { %1138 = vmatpush3.bf16.xpose.msra.mxu0 %v634_v42  ;;  %1139 = vmatprep.mubr.msk.bf16.mxu0 %vm1327_vm1, %v1326_v7 }
 0x17a   : > { %1149 = vmatprep.subr.bf16.mxu0 %v1326_v7 }
 0x180   : > { %1140 = vmatmul.mubr.msk.bf16.vlgmr.msra.gmra.mrb[4].mxu0 %vm279_vm0, %v627_v44 }
 0x181   : > { %1150 = vmatpush3.bf16.xpose.msra.mxu0 %v745_v45  ;;  %1151 = vmatprep.mubr.msk.bf16.mxu0 %vm1327_vm1, %v1326_v7 }
 0x182   : > { %1161 = vmatprep.subr.bf16.mxu0 %v1326_v7 }
 0x188   : > { %1152 = vmatmul.mubr.msk.bf16.vlgmr.msra.gmra.mrb[8].mxu0 %vm279_vm0, %v738_v46 }
 0x189   : > { %1177 = vmatprep.mubr.msk.bf16.mxu0 %vm1327_vm1, %v1326_v7 }
 0x1d6   : > { %v439_v47 = vpop.f32.mrb[8].mxu1 }
 0x1d7   : > { %v1117_v48 = vpop.f32.mrb[9].mxu1  ;;  %v446_v49 = vsel %vm445_vm3, %v439_v47, -inf }
 0x1d8   : > { %447 = vmax.xlane.f32.xlu0 %v446_v49  ;;  %v442_v50 = vpop.f32.mrb[10].mxu1 }
 0x1d9   : > { %v1118_v51 = vpop.f32.mrb[11].mxu1 }
 0x1da   : > { %v1237_v51 = vld [vmem:[%s1591_s3] sm:$0xff]  }
 0x1db   : > { %1162 = vmatpush3.bf16.msra.mxu0 %v1237_v51 }
 0x1dc   : > { %1163 = vmatprep.subr.bf16.mxu0 %v1326_v7 }
 0x24b   : > { %v556_v52 = vpop.f32.mrb[0].mxu0 }
 0x24c   : > { %v1129_v53 = vpop.f32.mrb[1].mxu0  ;;  %v562_v54 = vsel %vm445_vm3, %v556_v52, -inf }
 0x24d   : > { %563 = vmax.xlane.f32.xlu1 %v562_v54  ;;  %v559_v55 = vpop.f32.mrb[2].mxu0  ;;  %v1239_v53 = vld [vmem:[%s1591_s3 + $0x10] sm:$0xff]   ;;  %v1240_v54 = vld [vmem:[%s1591_s3 + $0x18] sm:$0xff]  }
 0x24e   : > { %v1130_v56 = vpop.f32.mrb[3].mxu0  ;;  %v1241_v55 = vld [vmem:[%s1591_s3 + $0x20] sm:$0xff]  }
 0x24f   : > { %v1242_v56 = vld [vmem:[%s1591_s3 + $0x28] sm:$0xff]  }
 0x253   : > { %v670_v57 = vpop.f32.mrb[4].mxu0 }
 0x254   : > { %v1141_v58 = vpop.f32.mrb[5].mxu0  ;;  %v676_v59 = vsel %vm445_vm3, %v670_v57, -inf }
 0x255   : > { %v673_v60 = vpop.f32.mrb[6].mxu0  ;;  %677 = vmax.xlane.f32.xlu0 %v676_v59 }
 0x256   : > { %v1142_v61 = vpop.f32.mrb[7].mxu0 }
 0x257   : > { %v1244_v61 = vld [vmem:[%s1591_s3 + $0x38] sm:$0xff]  }
 0x25b   : > { %v781_v62 = vpop.f32.mrb[8].mxu0 }
 0x25c   : > { %v1153_v63 = vpop.f32.mrb[9].mxu0  ;;  %v787_v0 = vsel %vm445_vm3, %v781_v62, -inf }
 0x25d   : > { %v784_v1 = vpop.f32.mrb[10].mxu0  ;;  %788 = vmax.xlane.f32.xlu0 %v787_v0 }
 0x25e   : > { %v1154_v2 = vpop.f32.mrb[11].mxu0 }
 0x265   : > { %v448_v3 = vpop.xlane.xlu0 %447 }
 0x266   : > { %v449_v4 = vsub.f32 %v439_v47, %v448_v3 }
 0x268   : > { %v450_v5 = vmul.f32 1.442695, %v449_v4 }
 0x26a   : > { %1245 = vpow2.f32 %v450_v5 }
 0x274   : > { %v1246_v6 = vpop.eup %1245 }
 0x275   : > { %v452_v8 = vsel %vm445_vm3, %v1246_v6, 0.0 }
 0x276   : > { %453 = vadd.xlane.f32.xlu1 %v452_v8 }
 0x287   : > { %577 = vrot.lane.b32.xlu1 %v1056_v9, %s1329_s9 }
 0x2da   : > { %v564_v10 = vpop.xlane.xlu1 %563 }
 0x2db   : > { %v565_v11 = vsub.f32 %v556_v52, %v564_v10  ;;  %v1238_v52 = vld [vmem:[%s1591_s3 + $0x8] sm:$0xff]  }
 0x2dc   : > { %1164 = vmatpush3.bf16.msra.mxu0 %v1238_v52 }
 0x2dd   : > { %v566_v12 = vmul.f32 1.442695, %v565_v11  ;;  %1165 = vmatprep.subr.bf16.mxu0 %v1326_v7 }
 0x2df   : > { %1247 = vpow2.f32 %v566_v12 }
 0x2e0   : > { %1166 = vmatpush3.bf16.msra.mxu0 %v1239_v53 }
 0x2e1   : > { %1167 = vmatprep.subr.bf16.mxu0 %v1326_v7 }
 0x2e2   : > { %v678_v13 = vpop.xlane.xlu0 %677 }
 0x2e3   : > { %v679_v14 = vsub.f32 %v670_v57, %v678_v13  ;;  %v1243_v57 = vld [vmem:[%s1591_s3 + $0x30] sm:$0xff]  }
 0x2e4   : > { %1168 = vmatpush3.bf16.msra.mxu0 %v1240_v54 }
 0x2e5   : > { %v680_v15 = vmul.f32 1.442695, %v679_v14  ;;  %1169 = vmatprep.subr.bf16.mxu0 %v1326_v7 }
 0x2e7   : > { %1249 = vpow2.f32 %v680_v15 }
 0x2e8   : > { %1170 = vmatpush3.bf16.msra.mxu0 %v1241_v55 }
 0x2e9   : > { %v1248_v16 = vpop.eup %1247  ;;  %1171 = vmatprep.subr.bf16.mxu0 %v1326_v7 }
 0x2ea   : > { %v789_v17 = vpop.xlane.xlu0 %788  ;;  %v568_v18 = vsel %vm445_vm3, %v1248_v16, 0.0 }
 0x2eb   : > { %v790_v19 = vsub.f32 %v781_v62, %v789_v17  ;;  %569 = vadd.xlane.f32.xlu0 %v568_v18  ;;  %v1062_v17 = vld [vmem:[%s1592_s4] ss:$0 sm:$0xff] }
 0x2ec   : > { %1172 = vmatpush3.bf16.msra.mxu0 %v1242_v56 }
 0x2ed   : > { %v791_v20 = vmul.f32 1.442695, %v790_v19  ;;  %1173 = vmatprep.subr.bf16.mxu0 %v1326_v7 }
 0x2ef   : > { %1251 = vpow2.f32 %v791_v20 }
 0x2f0   : > { %1174 = vmatpush3.bf16.msra.mxu0 %v1243_v57 }
 0x2f1   : > { %v1250_v21 = vpop.eup %1249  ;;  %1175 = vmatprep.subr.bf16.mxu0 %v1326_v7 }
 0x2f2   : > { %v682_v22 = vsel %vm445_vm3, %v1250_v21, 0.0 }
 0x2f3   : > { %683 = vadd.xlane.f32.xlu1 %v682_v22 }
 0x2f4   : > { %1176 = vmatpush3.bf16.msra.mxu0 %v1244_v61 }
 0x2f9   : > { %v1252_v23 = vpop.eup %1251 }
 0x2fa   : > { %v793_v24 = vsel %vm445_vm3, %v1252_v23, 0.0 }
 0x2fb   : > { %794 = vadd.xlane.f32.xlu0 %v793_v24 }
 0x303   : > { %v454_v25 = vpop.xlane.xlu1 %453 }
 0x304   : > { %1253 = vrcp.f32 %v454_v25  ;;  %799 = vrot.lane.b32.xlu1 %v1056_v9, %s1330_s10 }
 0x307   : > { %v578_v28 = vpop.permute.xlu1 %577 }
 0x308   : > { %v583_v30 = vsel %vm461_vm2, %v578_v28, 0 }
 0x30e   : > { %v1254_v26 = vpop.eup %1253 }
 0x30f   : > { %v456_v27 = vmul.f32 %v1254_v26, %v1246_v6 }
 0x311   : > { %688 = vrot.lane.b32.xlu0 %v1056_v9, %s1328_s8  ;;  %v457_v29 = vpack.c.bf16 %v456_v27, %v456_v27 }
 0x313   : > { %1122 = vmatmul.mubr.msk.bf16.vlgmr.msra.gmra.mrb[12].mxu1 %vm445_vm3, %v457_v29 }
 0x314   : > { %1132 = vmatpush3.bf16.msra.mxu1 %v583_v30  ;;  %1133 = vmatprep.mubr.msk.bf16.mxu1 %vm1327_vm1, %v1326_v7 }
 0x315   : > { %1143 = vmatprep.subr.bf16.mxu1 %v1326_v7 }
 0x378   : > { %v570_v31 = vpop.xlane.xlu0 %569 }
 0x379   : > { %1255 = vrcp.f32 %v570_v31 }
 0x380   : > { %v684_v32 = vpop.xlane.xlu1 %683 }
 0x381   : > { %1257 = vrcp.f32 %v684_v32 }
 0x383   : > { %v1256_v33 = vpop.eup %1255 }
 0x384   : > { %v572_v34 = vmul.f32 %v1256_v33, %v1248_v16  ;;  %v800_v41 = vpop.permute.xlu1 %799 }
 0x385   : > { %v805_v43 = vsel %vm461_vm2, %v800_v41, 0 }
 0x386   : > { %v573_v35 = vpack.c.bf16 %v572_v34, %v572_v34 }
 0x388   : > { %1134 = vmatmul.mubr.msk.bf16.vlgmr.msra.gmra.mrb[16].mxu1 %vm445_vm3, %v573_v35  ;;  %v795_v36 = vpop.xlane.xlu0 %794 }
 0x389   : > { %1259 = vrcp.f32 %v795_v36  ;;  %1145 = vmatprep.mubr.msk.bf16.mxu1 %vm1327_vm1, %v1326_v7 }
 0x38b   : > { %v1258_v37 = vpop.eup %1257 }
 0x38c   : > { %v686_v38 = vmul.f32 %v1258_v37, %v1250_v21  ;;  %v689_v39 = vpop.permute.xlu0 %688 }
 0x38d   : > { %v694_v40 = vsel %vm461_vm2, %v689_v39, 0 }
 0x38e   : > { %1144 = vmatpush3.bf16.msra.mxu1 %v694_v40  ;;  %v687_v42 = vpack.c.bf16 %v686_v38, %v686_v38 }
 0x38f   : > { %1155 = vmatprep.subr.bf16.mxu1 %v1326_v7 }
 0x391   : > { %1146 = vmatmul.mubr.msk.bf16.vlgmr.msra.gmra.mrb[20].mxu1 %vm445_vm3, %v687_v42 }
 0x392   : > { %1156 = vmatpush3.bf16.msra.mxu1 %v805_v43  ;;  %1157 = vmatprep.mubr.msk.bf16.mxu1 %vm1327_vm1, %v1326_v7 }
 0x393   : > { %v1260_v44 = vpop.eup %1259 }
 0x394   : > { %v797_v45 = vmul.f32 %v1260_v44, %v1252_v23 }
 0x396   : > { %v798_v46 = vpack.c.bf16 %v797_v45, %v797_v45 }
 0x399   : > { %1158 = vmatmul.mubr.msk.bf16.vlgmr.msra.gmra.mrb[24].mxu1 %vm445_vm3, %v798_v46 }
 0x3e6   : > { %v499_v47 = vpop.f32.mrb[12].mxu1 }
 0x3e7   : > { %v1123_v48 = vpop.f32.mrb[13].mxu1  ;;  %v505_v11 = vpack.c.bf16 %v499_v47, %v499_v47 }
 0x3e8   : > { %v502_v49 = vpop.f32.mrb[14].mxu1 }
 0x3e9   : > { %v1124_v50 = vpop.f32.mrb[15].mxu1 }
 0x45b   : > { %v619_v58 = vpop.f32.mrb[16].mxu1 }
 0x45c   : > { %v625_v59 = vpack.c.bf16 %v619_v58, %v619_v58  ;;  %v1135_v60 = vpop.f32.mrb[17].mxu1 }
 0x45d   : > { %v622_v62 = vpop.f32.mrb[18].mxu1 }
 0x45e   : > { %849 = vrot.lane.b32.xlu1 %v625_v59, %s1330_s10  ;;  %v1136_v63 = vpop.f32.mrb[19].mxu1 }
 0x464   : > { %v730_v0 = vpop.f32.mrb[20].mxu1 }
 0x465   : > { %v736_v1 = vpack.c.bf16 %v730_v0, %v730_v0  ;;  %v1147_v2 = vpop.f32.mrb[21].mxu1 }
 0x466   : > { %v733_v3 = vpop.f32.mrb[22].mxu1 }
 0x467   : > { %852 = vrot.lane.b32.xlu0 %v736_v1, %s1328_s8  ;;  %v1148_v4 = vpop.f32.mrb[23].mxu1  ;;  %s213_s8 = sand.u32 1, %s1315_s19  }
 0x468   : > { %s1039_s10 = sshll.u32 %s213_s8, 3 }
 0x469   : > { %s215_s16 = scalar_lea.vmem [#allocation3], %s1039_s10 }
 0x46a   : > { %s976_s17 = sshll.u32 %s215_s16, 4  ;;  %s1547_s17 = int_to_ptr.vmem [resolvable:$true] %s976_s17 }
 0x46b   : > { %s1261_s30 = scalar_lea.vmem %s1547_s17, 128  ;;  %p1268_p0 = scmp.lt.s32.totalorder %s1547_s17, %s1266_s7 }
 0x46c   : > { %v841_v5 = vpop.f32.mrb[24].mxu1  ;;  %p1262_p11 = scmp.ne.s32.totalorder %s1547_s17, %s1261_s30  ;;  %p1269_p1 = scmp.lt.s32.totalorder %s1267_s11, %s1261_s30 }
 0x46d   : > { %v847_v6 = vpack.c.bf16 %v841_v5, %v841_v5  ;;  %v1159_v8 = vpop.f32.mrb[25].mxu1 }
 0x46e   : > { %v844_v9 = vpop.f32.mrb[26].mxu1  ;;  %p1263_p12 = pnand %p1262_p11, %p1400_p5  ;;  %p1270_p2 = por %p1269_p1, %p1268_p0 }
 0x46f   : > { %855 = vrot.lane.b32.xlu1 %v847_v6, %s1329_s9  ;;  %v1160_v7 = vpop.f32.mrb[27].mxu1  ;;  %s1072_s9 = sshll.u32 %s1383_s22, 7  ;;  %s963_s22 = scalar_lea.sflag [#allocation4], %s213_s8 }
 0x470   : > { %s1545_s26 = scalar_lea.hbm %s1593_s5, %s1072_s9  ;;  %p1264_p13 = pneg %p1263_p12 }
 0x472   : > { %p1271_p3 = pnand %p1270_p2, %p1264_p13 }
 0x4d0   : > { %v850_v10 = vpop.permute.xlu1 %849 }
 0x4d1   : > { %v859_v13 = vsel %vm279_vm0, %v505_v11, %v850_v10 }
 0x4d9   : > { %v853_v12 = vpop.permute.xlu0 %852 }
 0x4da   : > { %v862_v14 = vsel %vm860_vm4, %v859_v13, %v853_v12 }
 0x4e1   : > { %v856_v15 = vpop.permute.xlu1 %855 }
 0x4e2   : > { %v865_v16 = vsel %vm863_vm5, %v862_v14, %v856_v15 }
 0x4e3   : > { %1178 = vmatmul.mubr.bf16.vlgmr.msra.gmra.mrb[12].mxu0 %v865_v16 }
 0x5b6   : > { %v955_v18 = vpop.f32.mrb[12].mxu0 }
 0x5b7   : > { %v956_v19 = vadd.f32 %v1062_v17, %v955_v18  ;;  %v1179_v20 = vpop.f32.mrb[13].mxu0 }
 0x5b8   : > { %v958_v21 = vpop.f32.mrb[14].mxu0 }
 0x5b9   : > { %v1180_v22 = vpop.f32.mrb[15].mxu0  ;;  %961 = vst.msk [vmem:[%s215_s16] sm:$0xff] %vm279_vm0, %v956_v19 }
 0x5ba   : > { %1274 = shalt.err (!%p1271_p3)
}
 0x5bb   : > { %s1275_s12 = scalar_lea.hbm %s1545_s26, 128  ;;  %s1279_s10 = scalar_lea.hbm %s1593_s5, 256 }
 0x5bc   : > { %p1276_p4 = scmp.ne.s32.totalorder %s1545_s26, %s1275_s12  ;;  %p1280_p9 = scmp.lt.u32.totalorder %s1545_s26, %s1593_s5 }
 0x5bd   : > { %p1281_p10 = scmp.lt.u32.totalorder %s1279_s10, %s1275_s12  ;;  %p1283_p12 = scmp.lt.u32.totalorder %s1275_s12, %s1545_s26 }
 0x5be   : > { %p1277_p7 = pnand %p1276_p4, %p1400_p5 }
 0x5bf   : > { %p1282_p11 = por %p1281_p10, %p1280_p9 }
 0x5c0   : > { %p1278_p8 = pneg %p1277_p7 }
 0x5c1   : > { %p1284_p13 = por %p1283_p12, %p1282_p11 }
 0x5c3   : > { %p1285_p0 = pnand %p1284_p13, %p1278_p8 }
 0x5c5   : > { %1288 = shalt.err (!%p1285_p0)
}
 0x5c6   : > { %1181 = dma.vmem_to_hbm [thread:$0]  (%p1400_p5), %s1547_s17, 128, %s1545_s26, %s963_s22  }
 0x5c7 PF: > { %p1187_p1 = scmp.ge.s32.totalorder %s1323_s21, 2  ;;  %s988_s9 = sand.u32 1, %s1311_s18  }
 0x5c8   : > { %s989_s16 = scalar_lea.sflag [#allocation4], %s988_s9 }
 0x5c9   : > { %p1184_p2 = pnand %p1187_p1, %p1404_p6 }
 0x5cb   : > { %1306 = dma.done.wait (!%p1184_p2), %s989_s16, 128  }
 0x5cc   : > { %1308 = vsyncadd (!%p1184_p2), %s989_s16, 4294967168  ;;  %p15_p3 = scmp.ge.s32.totalorder %s1387_s24, 4   ;;  %s1596_s18 = smov %s1315_s19 }
 0x5cd   : > { %s1597_s19 = smov %s1319_s20  ;;  %s1598_s20 = smov %s1398_s27 }
 0x5ce   : > { %s1599_s21 = smov %s1387_s24  ;;  %17 = sbr.rel (!%p15_p3) target bundleno = 3 (0x3), region = 75 }
 0x5d5   :  { %994 = vsyncpa [#allocation4], 1 }
 0x5d6   :  { %996 = vsyncpa [#allocation4 + $0x1], 1 }

// kernel: tpu_custom_call.1
= control target key start
LH: loop header
LB: loop body
LE: loop exit
PB: predicated region body
PF: predicated region fallthrough
CT: control target
= control target key end

     0   :  { %10 = vsyncpa [#allocation4], 0  ;;  %s1588_s0 = inlined_call_operand.vmem [shape: bf16[16,32], index: 0, kind: input, shape index: {}]   ;;  %s1589_s1 = inlined_call_operand.vmem [shape: bf16[32,384], index: 1, kind: input, shape index: {}]   ;;  %s1590_s2 = inlined_call_operand.vmem [shape: f32[1,384], index: 2, kind: input, shape index: {}]   ;;  %s1591_s3 = inlined_call_operand.vmem [shape: bf16[128,32], index: 3, kind: input, shape index: {}]   ;;  %s1592_s4 = inlined_call_operand.vmem [shape: f32[1,32], index: 4, kind: input, shape index: {}]   ;;  %s1593_s5 = inlined_call_operand.hbm [shape: f32[16,32], index: 5, kind: output, shape index: {}]  }
   0x1   :  { %12 = vsyncpa [#allocation4 + $0x1], 0  ;;  %s1362_s18 = smov 0   ;;  %s1364_s19 = smov 0  }
   0x2   :  { %s1366_s20 = smov 0   ;;  %s1368_s21 = smov 0  }
   0x3 LB: > { %s1383_s22 = sadd.s32 4294967295, %s1323_s21   ;;  %s1035_s23 = sadd.s32 4294967294, %s1323_s21   ;;  %s1323_s21 = sphi %s1368_s21, %s1599_s21   ;;  %s1319_s20 = sphi %s1366_s20, %s1598_s20   ;;  %s1315_s19 = sphi %s1364_s19, %s1597_s19   ;;  %s1311_s18 = sphi %s1362_s18, %s1596_s18  }
   0x4   : > { %s1387_s24 = sadd.s32 1, %s1323_s21   ;;  %s135_s25 = sadd.s32 1, %s1319_s20 }
   0x5   : > { %s132_s26 = ssub.s32 %s1323_s21, %s1387_s24  ;;  %p145_p0 = scmp.ne.s32.totalorder %s1319_s20, %s1315_s19 }
   0x6   : > { %p133_p1 = scmp.eq.s32.totalorder %s132_s26, 0  ;;  %p146_p2 = scmp.eq.s32.totalorder %s1383_s22, 1 }
   0x7   : > { %p151_p3 = scmp.ne.s32.totalorder %s1315_s19, %s1311_s18  ;;  %p152_p4 = scmp.eq.s32.totalorder %s1035_s23, 1 }
   0x8   : > { %s1398_s27 = scalar_select %p133_p1, %s1319_s20, %s135_s25  }
   0x9   : > { %p1400_p5 = por %p146_p2, %p145_p0  ;;  %p1404_p6 = por %p152_p4, %p151_p3 }
   0xa   : > { %p1038_p7 = scmp.ge.s32.totalorder %s1323_s21, 1  ;;  %p189_p8 = scmp.lt.s32.totalorder %s1323_s21, 3 }
   0xc   : > { %p190_p9 = pnand %p1038_p7, %p189_p8 }
   0xd   : > { %v1226_v0 = vld [vmem:[%s1589_s1 + $0x4] ss:$12 sps:$4 sm:$0xff] (!%p190_p9)   ;;  %p216_p10 = scmp.lt.s32.totalorder (!%p190_p9), %s1383_s22, 1  ;;  %v1228_v1 = vld [vmem:[%s1589_s1] ss:$12 sps:$4 sm:$0xff] (!%p190_p9)   ;;  %v1325_v2 = vmov (!%p190_p9), 0   ;;  %v232_v9 = vlaneseq (!%p190_p9) }
   0xe   : > { %193 = sbr.rel (%p190_p9) target bundleno = 1479 (0x5c7), region = 40  ;;  %315 = vmatprep.mubr.bf16.mxu1 (!%p190_p9), %v1325_v2  ;;  %283 = vmatprep.subr.bf16.mxu1 (!%p190_p9), %v1226_v0  ;;  %v1229_v3 = vld [vmem:[%s1589_s1 + $0x1c] ss:$12 sps:$4 sm:$0xff] (!%p190_p9)   ;;  %v1231_v4 = vld [vmem:[%s1589_s1 + $0x18] ss:$12 sps:$4 sm:$0xff] (!%p190_p9)   ;;  %vm279_vm0 = vcmask (!%p190_p9), 261120  }
   0xf   : > { %284 = vmatpush1.bf16.msra.mxu1 (!%p190_p9), %v1228_v1  ;;  %v1232_v6 = vld [vmem:[%s1589_s1 + $0x8] ss:$12 sps:$4 sm:$0xff] (!%p190_p9)   ;;  %v1326_v7 = vmov (!%p190_p9), 0.0   ;;  %v1233_v8 = vld [vmem:[%s1589_s1 + $0x20] ss:$12 sps:$4 sm:$0xff] (!%p190_p9)   ;;  %vm1327_vm1 = vmmov (!%p190_p9), 0  }
  0x10   : > { %285 = vmatprep.subr.bf16.mxu1 (!%p190_p9), %v1229_v3  ;;  %1125 = vmatprep.subr.bf16.mxu0 (!%p190_p9), %v1326_v7  ;;  %v233_v10 = vshrl.u32 (!%p190_p9), %v232_v9, 7  ;;  %v230_v12 = vld [vmem:[%s1590_s2] sm:$0x7] (!%p190_p9)  ;;  %s1328_s8 = smov (!%p190_p9), 64   ;;  %s1329_s9 = smov (!%p190_p9), 96   ;;  %vm461_vm2 = vcmask (!%p190_p9), 1043456  }
  0x11   : > { %1127 = vmatprep.mubr.msk.bf16.mxu0 (!%p190_p9), %vm1327_vm1, %v1326_v7  ;;  %s1330_s10 = smov (!%p190_p9), 32   ;;  %vm445_vm3 = vcmask (!%p190_p9), 64512   ;;  %vm860_vm4 = vcmask (!%p190_p9), 523264   ;;  %vm863_vm5 = vcmask (!%p190_p9), 785408   ;;  %s1331_s6 = smov (!%p190_p9), [#allocation3]  }
  0x12   : > { %v234_v11 = vsub.s32 (!%p190_p9), 0, %v233_v10  ;;  %v238_v13 = vsub.s32 (!%p190_p9), 1, %v233_v10  ;;  %v242_v28 = vsub.s32 (!%p190_p9), 2, %v233_v10  ;;  %s1265_s7 = sshll.u32 (!%p190_p9), %s1331_s6, 4  ;;  %s1266_s7 = int_to_ptr.vmem [resolvable:$false] %s1265_s7 }
  0x13   : > { %286 = vmatpush1.bf16.msra.mxu1 (!%p190_p9), %v1231_v4 }
  0x14   : > { %1105 = vmatprep.subr.bf16.mxu1 (!%p190_p9), %v1326_v7  ;;  %v235_v14 = vrot.slane (!%p190_p9), %v230_v12, %v234_v11  ;;  %v239_v15 = vrot.slane (!%p190_p9), %v230_v12, %v238_v13  ;;  %v243_v29 = vrot.slane (!%p190_p9), %v230_v12, %v242_v28 }
  0x15   : > { %s217_s11 = scalar_select %p216_p10, %s1383_s22, 1 }
  0x17   : > { %s1040_s14 = sshll.u32 %s217_s11, 2  ;;  %s1267_s11 = scalar_lea.vmem %s1266_s7, 256 }
  0x18   : > { %s219_s17 = scalar_lea.vmem %s1588_s0, %s1040_s14 }
  0x19   : > { %v221_v5 = vld [vmem:[%s219_s17] sm:$0xf] }
  0x1a   : > { %1047 = vmatmul.mubr.msk.bf16.vlgmr.msra.gmra.mrb[0].mxu1 %vm279_vm0, %v221_v5 }
  0x1b   : > { %1106 = vmatpush3.bf16.msra.mxu1 %v1232_v6  ;;  %1109 = vmatprep.mubr.msk.bf16.mxu1 %vm1327_vm1, %v1326_v7 }
  0x1c   : > { %1107 = vmatprep.subr.bf16.mxu1 %v1326_v7 }
  0x1f   : > { %1108 = vmatpush3.bf16.msra.mxu1 %v1233_v8 }
  0x20   : > { %1113 = vmatprep.subr.bf16.mxu1 %v1326_v7 }
  0x22   : > { %1110 = vmatmul.mubr.msk.bf16.vlgmr.msra.gmra.mrb[4].mxu1 %vm279_vm0, %v221_v5 }
  0x23   : > { %1115 = vmatprep.mubr.msk.bf16.mxu1 %vm1327_vm1, %v1326_v7 }
  0xed   : > { %v317_v16 = vpop.f32.mrb[0].mxu1 }
  0xee   : > { %v318_v17 = vadd.f32 %v317_v16, %v235_v14  ;;  %v319_v18 = vpop.f32.mrb[1].mxu1 }
  0xef   : > { %v320_v19 = vadd.f32 %v319_v18, %v239_v15  ;;  %v321_v20 = vpop.f32.mrb[2].mxu1 }
  0xf0   : > { %v322_v21 = vpop.f32.mrb[3].mxu1 }
  0xf1   : > { %v1075_v22 = vpack.c.bf16 %v320_v19, %v318_v17 }
  0xf3   : > { %377 = vst [vmem:[#allocation2] sm:$0xff] %v1075_v22 }
  0xf5   : > { %v358_v30 = vpop.f32.mrb[4].mxu1 }
  0xf6   : > { %v359_v31 = vadd.f32 %v358_v30, %v243_v29  ;;  %v1111_v32 = vpop.f32.mrb[5].mxu1 }
  0xf7   : > { %v361_v33 = vpop.f32.mrb[6].mxu1 }
  0xf8   : > { %v1076_v34 = vpack.c.bf16 %v359_v31, %v359_v31  ;;  %v1112_v35 = vpop.f32.mrb[7].mxu1 }
  0xfa   : > { %v397_v23 = vld [vmem:[#allocation2 + $0x4] sm:$0xf]  ;;  %v396_v26 = vld [vmem:[#allocation2] sm:$0xf]  ;;  %378 = vst [vmem:[#allocation2 + $0x8] sm:$0xf] %v1076_v34 }
  0xfb   : > { %v403_v24 = vsel %vm279_vm0, %v397_v23, 0  ;;  %v1054_v25 = vcombine.low %v397_v23, %v397_v23  ;;  %v1053_v27 = vcombine.low %v396_v26, %v396_v26 }
  0xfc   : > { %1114 = vmatpush3.bf16.xpose.msra.mxu1 %v403_v24 }
  0xfd   : > { %628 = vrot.lane.b32.xlu1 %v1054_v25, %s1328_s8  ;;  %514 = vrot.lane.b32.xlu0 %v1054_v25, %s1329_s9 }
  0xfe   : > { %1119 = vmatprep.subr.bf16.mxu1 %v1326_v7 }
 0x101   : > { %626 = vrot.lane.b32.xlu1 %v1053_v27, %s1328_s8  ;;  %509 = vrot.lane.b32.xlu0 %v1053_v27, %s1329_s9  ;;  %v398_v36 = vld [vmem:[#allocation2 + $0x8] sm:$0xf] }
 0x102   : > { %v463_v37 = vsel %vm461_vm2, %v398_v36, 0  ;;  %v1056_v9 = vcombine.low %v398_v36, %v398_v36 }
 0x103   : > { %1116 = vmatmul.mubr.msk.bf16.vlgmr.msra.gmra.mrb[8].mxu1 %vm279_vm0, %v396_v26 }
 0x104   : > { %1121 = vmatprep.mubr.msk.bf16.mxu1 %vm1327_vm1, %v1326_v7  ;;  %1120 = vmatpush3.bf16.msra.mxu1 %v463_v37 }
 0x105   : > { %737 = vrot.lane.b32.xlu1 %v1053_v27, %s1330_s10  ;;  %739 = vrot.lane.b32.xlu0 %v1054_v25, %s1330_s10 }
 0x106   : > { %1131 = vmatprep.subr.bf16.mxu1 %v1326_v7 }
 0x16f   : > { %v515_v38 = vpop.permute.xlu0 %514  ;;  %v629_v40 = vpop.permute.xlu1 %628 }
 0x170   : > { %v520_v39 = vsel %vm279_vm0, %v515_v38, 0  ;;  %v634_v42 = vsel %vm279_vm0, %v629_v40, 0 }
 0x171   : > { %1126 = vmatpush3.bf16.xpose.msra.mxu0 %v520_v39 }
 0x172   : > { %1137 = vmatprep.subr.bf16.mxu0 %v1326_v7 }
 0x173   : > { %v510_v41 = vpop.permute.xlu0 %509  ;;  %v627_v44 = vpop.permute.xlu1 %626 }
 0x177   : > { %v740_v43 = vpop.permute.xlu0 %739  ;;  %v738_v46 = vpop.permute.xlu1 %737 }
 0x178   : > { %1128 = vmatmul.mubr.msk.bf16.vlgmr.msra.gmra.mrb[0].mxu0 %vm279_vm0, %v510_v41  ;;  %v745_v45 = vsel %vm279_vm0, %v740_v43, 0 }
 0x179   : > { %1138 = vmatpush3.bf16.xpose.msra.mxu0 %v634_v42  ;;  %1139 = vmatprep.mubr.msk.bf16.mxu0 %vm1327_vm1, %v1326_v7 }
 0x17a   : > { %1149 = vmatprep.subr.bf16.mxu0 %v1326_v7 }
 0x180   : > { %1140 = vmatmul.mubr.msk.bf16.vlgmr.msra.gmra.mrb[4].mxu0 %vm279_vm0, %v627_v44 }
 0x181   : > { %1150 = vmatpush3.bf16.xpose.msra.mxu0 %v745_v45  ;;  %1151 = vmatprep.mubr.msk.bf16.mxu0 %vm1327_vm1, %v1326_v7 }
 0x182   : > { %1161 = vmatprep.subr.bf16.mxu0 %v1326_v7 }
 0x188   : > { %1152 = vmatmul.mubr.msk.bf16.vlgmr.msra.gmra.mrb[8].mxu0 %vm279_vm0, %v738_v46 }
 0x189   : > { %1177 = vmatprep.mubr.msk.bf16.mxu0 %vm1327_vm1, %v1326_v7 }
 0x1d6   : > { %v439_v47 = vpop.f32.mrb[8].mxu1 }
 0x1d7   : > { %v1117_v48 = vpop.f32.mrb[9].mxu1  ;;  %v446_v49 = vsel %vm445_vm3, %v439_v47, -inf }
 0x1d8   : > { %447 = vmax.xlane.f32.xlu0 %v446_v49  ;;  %v442_v50 = vpop.f32.mrb[10].mxu1 }
 0x1d9   : > { %v1118_v51 = vpop.f32.mrb[11].mxu1 }
 0x1da   : > { %v1237_v51 = vld [vmem:[%s1591_s3] sm:$0xff]  }
 0x1db   : > { %1162 = vmatpush3.bf16.msra.mxu0 %v1237_v51 }
 0x1dc   : > { %1163 = vmatprep.subr.bf16.mxu0 %v1326_v7 }
 0x24b   : > { %v556_v52 = vpop.f32.mrb[0].mxu0 }
 0x24c   : > { %v1129_v53 = vpop.f32.mrb[1].mxu0  ;;  %v562_v54 = vsel %vm445_vm3, %v556_v52, -inf }
 0x24d   : > { %563 = vmax.xlane.f32.xlu1 %v562_v54  ;;  %v559_v55 = vpop.f32.mrb[2].mxu0  ;;  %v1239_v53 = vld [vmem:[%s1591_s3 + $0x10] sm:$0xff]   ;;  %v1240_v54 = vld [vmem:[%s1591_s3 + $0x18] sm:$0xff]  }
 0x24e   : > { %v1130_v56 = vpop.f32.mrb[3].mxu0  ;;  %v1241_v55 = vld [vmem:[%s1591_s3 + $0x20] sm:$0xff]  }
 0x24f   : > { %v1242_v56 = vld [vmem:[%s1591_s3 + $0x28] sm:$0xff]  }
 0x253   : > { %v670_v57 = vpop.f32.mrb[4].mxu0 }
 0x254   : > { %v1141_v58 = vpop.f32.mrb[5].mxu0  ;;  %v676_v59 = vsel %vm445_vm3, %v670_v57, -inf }
 0x255   : > { %v673_v60 = vpop.f32.mrb[6].mxu0  ;;  %677 = vmax.xlane.f32.xlu0 %v676_v59 }
 0x256   : > { %v1142_v61 = vpop.f32.mrb[7].mxu0 }
 0x257   : > { %v1244_v61 = vld [vmem:[%s1591_s3 + $0x38] sm:$0xff]  }
 0x25b   : > { %v781_v62 = vpop.f32.mrb[8].mxu0 }
 0x25c   : > { %v1153_v63 = vpop.f32.mrb[9].mxu0  ;;  %v787_v0 = vsel %vm445_vm3, %v781_v62, -inf }
 0x25d   : > { %v784_v1 = vpop.f32.mrb[10].mxu0  ;;  %788 = vmax.xlane.f32.xlu0 %v787_v0 }
 0x25e   : > { %v1154_v2 = vpop.f32.mrb[11].mxu0 }
 0x265   : > { %v448_v3 = vpop.xlane.xlu0 %447 }
 0x266   : > { %v449_v4 = vsub.f32 %v439_v47, %v448_v3 }
 0x268   : > { %v450_v5 = vmul.f32 1.442695, %v449_v4 }
 0x26a   : > { %1245 = vpow2.f32 %v450_v5 }
 0x274   : > { %v1246_v6 = vpop.eup %1245 }
 0x275   : > { %v452_v8 = vsel %vm445_vm3, %v1246_v6, 0.0 }
 0x276   : > { %453 = vadd.xlane.f32.xlu1 %v452_v8 }
 0x287   : > { %577 = vrot.lane.b32.xlu1 %v1056_v9, %s1329_s9 }
 0x2da   : > { %v564_v10 = vpop.xlane.xlu1 %563 }
 0x2db   : > { %v565_v11 = vsub.f32 %v556_v52, %v564_v10  ;;  %v1238_v52 = vld [vmem:[%s1591_s3 + $0x8] sm:$0xff]  }
 0x2dc   : > { %1164 = vmatpush3.bf16.msra.mxu0 %v1238_v52 }
 0x2dd   : > { %v566_v12 = vmul.f32 1.442695, %v565_v11  ;;  %1165 = vmatprep.subr.bf16.mxu0 %v1326_v7 }
 0x2df   : > { %1247 = vpow2.f32 %v566_v12 }
 0x2e0   : > { %1166 = vmatpush3.bf16.msra.mxu0 %v1239_v53 }
 0x2e1   : > { %1167 = vmatprep.subr.bf16.mxu0 %v1326_v7 }
 0x2e2   : > { %v678_v13 = vpop.xlane.xlu0 %677 }
 0x2e3   : > { %v679_v14 = vsub.f32 %v670_v57, %v678_v13  ;;  %v1243_v57 = vld [vmem:[%s1591_s3 + $0x30] sm:$0xff]  }
 0x2e4   : > { %1168 = vmatpush3.bf16.msra.mxu0 %v1240_v54 }
 0x2e5   : > { %v680_v15 = vmul.f32 1.442695, %v679_v14  ;;  %1169 = vmatprep.subr.bf16.mxu0 %v1326_v7 }
 0x2e7   : > { %1249 = vpow2.f32 %v680_v15 }
 0x2e8   : > { %1170 = vmatpush3.bf16.msra.mxu0 %v1241_v55 }
 0x2e9   : > { %v1248_v16 = vpop.eup %1247  ;;  %1171 = vmatprep.subr.bf16.mxu0 %v1326_v7 }
 0x2ea   : > { %v789_v17 = vpop.xlane.xlu0 %788  ;;  %v568_v18 = vsel %vm445_vm3, %v1248_v16, 0.0 }
 0x2eb   : > { %v790_v19 = vsub.f32 %v781_v62, %v789_v17  ;;  %569 = vadd.xlane.f32.xlu0 %v568_v18  ;;  %v1062_v17 = vld [vmem:[%s1592_s4] ss:$0 sm:$0xff] }
 0x2ec   : > { %1172 = vmatpush3.bf16.msra.mxu0 %v1242_v56 }
 0x2ed   : > { %v791_v20 = vmul.f32 1.442695, %v790_v19  ;;  %1173 = vmatprep.subr.bf16.mxu0 %v1326_v7 }
 0x2ef   : > { %1251 = vpow2.f32 %v791_v20 }
 0x2f0   : > { %1174 = vmatpush3.bf16.msra.mxu0 %v1243_v57 }
 0x2f1   : > { %v1250_v21 = vpop.eup %1249  ;;  %1175 = vmatprep.subr.bf16.mxu0 %v1326_v7 }
 0x2f2   : > { %v682_v22 = vsel %vm445_vm3, %v1250_v21, 0.0 }
 0x2f3   : > { %683 = vadd.xlane.f32.xlu1 %v682_v22 }
 0x2f4   : > { %1176 = vmatpush3.bf16.msra.mxu0 %v1244_v61 }
 0x2f9   : > { %v1252_v23 = vpop.eup %1251 }
 0x2fa   : > { %v793_v24 = vsel %vm445_vm3, %v1252_v23, 0.0 }
 0x2fb   : > { %794 = vadd.xlane.f32.xlu0 %v793_v24 }
 0x303   : > { %v454_v25 = vpop.xlane.xlu1 %453 }
 0x304   : > { %1253 = vrcp.f32 %v454_v25  ;;  %799 = vrot.lane.b32.xlu1 %v1056_v9, %s1330_s10 }
 0x307   : > { %v578_v28 = vpop.permute.xlu1 %577 }
 0x308   : > { %v583_v30 = vsel %vm461_vm2, %v578_v28, 0 }
 0x30e   : > { %v1254_v26 = vpop.eup %1253 }
 0x30f   : > { %v456_v27 = vmul.f32 %v1254_v26, %v1246_v6 }
 0x311   : > { %688 = vrot.lane.b32.xlu0 %v1056_v9, %s1328_s8  ;;  %v457_v29 = vpack.c.bf16 %v456_v27, %v456_v27 }
 0x313   : > { %1122 = vmatmul.mubr.msk.bf16.vlgmr.msra.gmra.mrb[12].mxu1 %vm445_vm3, %v457_v29 }
 0x314   : > { %1132 = vmatpush3.bf16.msra.mxu1 %v583_v30  ;;  %1133 = vmatprep.mubr.msk.bf16.mxu1 %vm1327_vm1, %v1326_v7 }
 0x315   : > { %1143 = vmatprep.subr.bf16.mxu1 %v1326_v7 }
 0x378   : > { %v570_v31 = vpop.xlane.xlu0 %569 }
 0x379   : > { %1255 = vrcp.f32 %v570_v31 }
 0x380   : > { %v684_v32 = vpop.xlane.xlu1 %683 }
 0x381   : > { %1257 = vrcp.f32 %v684_v32 }
 0x383   : > { %v1256_v33 = vpop.eup %1255 }
 0x384   : > { %v572_v34 = vmul.f32 %v1256_v33, %v1248_v16  ;;  %v800_v41 = vpop.permute.xlu1 %799 }
 0x385   : > { %v805_v43 = vsel %vm461_vm2, %v800_v41, 0 }
 0x386   : > { %v573_v35 = vpack.c.bf16 %v572_v34, %v572_v34 }
 0x388   : > { %1134 = vmatmul.mubr.msk.bf16.vlgmr.msra.gmra.mrb[16].mxu1 %vm445_vm3, %v573_v35  ;;  %v795_v36 = vpop.xlane.xlu0 %794 }
 0x389   : > { %1259 = vrcp.f32 %v795_v36  ;;  %1145 = vmatprep.mubr.msk.bf16.mxu1 %vm1327_vm1, %v1326_v7 }
 0x38b   : > { %v1258_v37 = vpop.eup %1257 }
 0x38c   : > { %v686_v38 = vmul.f32 %v1258_v37, %v1250_v21  ;;  %v689_v39 = vpop.permute.xlu0 %688 }
 0x38d   : > { %v694_v40 = vsel %vm461_vm2, %v689_v39, 0 }
 0x38e   : > { %1144 = vmatpush3.bf16.msra.mxu1 %v694_v40  ;;  %v687_v42 = vpack.c.bf16 %v686_v38, %v686_v38 }
 0x38f   : > { %1155 = vmatprep.subr.bf16.mxu1 %v1326_v7 }
 0x391   : > { %1146 = vmatmul.mubr.msk.bf16.vlgmr.msra.gmra.mrb[20].mxu1 %vm445_vm3, %v687_v42 }
 0x392   : > { %1156 = vmatpush3.bf16.msra.mxu1 %v805_v43  ;;  %1157 = vmatprep.mubr.msk.bf16.mxu1 %vm1327_vm1, %v1326_v7 }
 0x393   : > { %v1260_v44 = vpop.eup %1259 }
 0x394   : > { %v797_v45 = vmul.f32 %v1260_v44, %v1252_v23 }
 0x396   : > { %v798_v46 = vpack.c.bf16 %v797_v45, %v797_v45 }
 0x399   : > { %1158 = vmatmul.mubr.msk.bf16.vlgmr.msra.gmra.mrb[24].mxu1 %vm445_vm3, %v798_v46 }
 0x3e6   : > { %v499_v47 = vpop.f32.mrb[12].mxu1 }
 0x3e7   : > { %v1123_v48 = vpop.f32.mrb[13].mxu1  ;;  %v505_v11 = vpack.c.bf16 %v499_v47, %v499_v47 }
 0x3e8   : > { %v502_v49 = vpop.f32.mrb[14].mxu1 }
 0x3e9   : > { %v1124_v50 = vpop.f32.mrb[15].mxu1 }
 0x45b   : > { %v619_v58 = vpop.f32.mrb[16].mxu1 }
 0x45c   : > { %v625_v59 = vpack.c.bf16 %v619_v58, %v619_v58  ;;  %v1135_v60 = vpop.f32.mrb[17].mxu1 }
 0x45d   : > { %v622_v62 = vpop.f32.mrb[18].mxu1 }
 0x45e   : > { %849 = vrot.lane.b32.xlu1 %v625_v59, %s1330_s10  ;;  %v1136_v63 = vpop.f32.mrb[19].mxu1 }
 0x464   : > { %v730_v0 = vpop.f32.mrb[20].mxu1 }
 0x465   : > { %v736_v1 = vpack.c.bf16 %v730_v0, %v730_v0  ;;  %v1147_v2 = vpop.f32.mrb[21].mxu1 }
 0x466   : > { %v733_v3 = vpop.f32.mrb[22].mxu1 }
 0x467   : > { %852 = vrot.lane.b32.xlu0 %v736_v1, %s1328_s8  ;;  %v1148_v4 = vpop.f32.mrb[23].mxu1  ;;  %s213_s8 = sand.u32 1, %s1315_s19  }
 0x468   : > { %s1039_s10 = sshll.u32 %s213_s8, 3 }
 0x469   : > { %s215_s16 = scalar_lea.vmem [#allocation3], %s1039_s10 }
 0x46a   : > { %s976_s17 = sshll.u32 %s215_s16, 4  ;;  %s1547_s17 = int_to_ptr.vmem [resolvable:$true] %s976_s17 }
 0x46b   : > { %s1261_s30 = scalar_lea.vmem %s1547_s17, 128  ;;  %p1268_p0 = scmp.lt.s32.totalorder %s1547_s17, %s1266_s7 }
 0x46c   : > { %v841_v5 = vpop.f32.mrb[24].mxu1  ;;  %p1262_p11 = scmp.ne.s32.totalorder %s1547_s17, %s1261_s30  ;;  %p1269_p1 = scmp.lt.s32.totalorder %s1267_s11, %s1261_s30 }
 0x46d   : > { %v847_v6 = vpack.c.bf16 %v841_v5, %v841_v5  ;;  %v1159_v8 = vpop.f32.mrb[25].mxu1 }
 0x46e   : > { %v844_v9 = vpop.f32.mrb[26].mxu1  ;;  %p1263_p12 = pnand %p1262_p11, %p1400_p5  ;;  %p1270_p2 = por %p1269_p1, %p1268_p0 }
 0x46f   : > { %855 = vrot.lane.b32.xlu1 %v847_v6, %s1329_s9  ;;  %v1160_v7 = vpop.f32.mrb[27].mxu1  ;;  %s1072_s9 = sshll.u32 %s1383_s22, 7  ;;  %s963_s22 = scalar_lea.sflag [#allocation4], %s213_s8 }
 0x470   : > { %s1545_s26 = scalar_lea.hbm %s1593_s5, %s1072_s9  ;;  %p1264_p13 = pneg %p1263_p12 }
 0x472   : > { %p1271_p3 = pnand %p1270_p2, %p1264_p13 }
 0x4d0   : > { %v850_v10 = vpop.permute.xlu1 %849 }
 0x4d1   : > { %v859_v13 = vsel %vm279_vm0, %v505_v11, %v850_v10 }
 0x4d9   : > { %v853_v12 = vpop.permute.xlu0 %852 }
 0x4da   : > { %v862_v14 = vsel %vm860_vm4, %v859_v13, %v853_v12 }
 0x4e1   : > { %v856_v15 = vpop.permute.xlu1 %855 }
 0x4e2   : > { %v865_v16 = vsel %vm863_vm5, %v862_v14, %v856_v15 }
 0x4e3   : > { %1178 = vmatmul.mubr.bf16.vlgmr.msra.gmra.mrb[12].mxu0 %v865_v16 }
 0x5b6   : > { %v955_v18 = vpop.f32.mrb[12].mxu0 }
 0x5b7   : > { %v956_v19 = vadd.f32 %v1062_v17, %v955_v18  ;;  %v1179_v20 = vpop.f32.mrb[13].mxu0 }
 0x5b8   : > { %v958_v21 = vpop.f32.mrb[14].mxu0 }
 0x5b9   : > { %v1180_v22 = vpop.f32.mrb[15].mxu0  ;;  %961 = vst.msk [vmem:[%s215_s16] sm:$0xff] %vm279_vm0, %v956_v19 }
 0x5ba   : > { %1274 = shalt.err (!%p1271_p3)
}
 0x5bb   : > { %s1275_s12 = scalar_lea.hbm %s1545_s26, 128  ;;  %s1279_s10 = scalar_lea.hbm %s1593_s5, 256 }
 0x5bc   : > { %p1276_p4 = scmp.ne.s32.totalorder %s1545_s26, %s1275_s12  ;;  %p1280_p9 = scmp.lt.u32.totalorder %s1545_s26, %s1593_s5 }
 0x5bd   : > { %p1281_p10 = scmp.lt.u32.totalorder %s1279_s10, %s1275_s12  ;;  %p1283_p12 = scmp.lt.u32.totalorder %s1275_s12, %s1545_s26 }
 0x5be   : > { %p1277_p7 = pnand %p1276_p4, %p1400_p5 }
 0x5bf   : > { %p1282_p11 = por %p1281_p10, %p1280_p9 }
 0x5c0   : > { %p1278_p8 = pneg %p1277_p7 }
 0x5c1   : > { %p1284_p13 = por %p1283_p12, %p1282_p11 }
 0x5c3   : > { %p1285_p0 = pnand %p1284_p13, %p1278_p8 }
 0x5c5   : > { %1288 = shalt.err (!%p1285_p0)
}
 0x5c6   : > { %1181 = dma.vmem_to_hbm [thread:$0]  (%p1400_p5), %s1547_s17, 128, %s1545_s26, %s963_s22  }
 0x5c7 PF: > { %p1187_p1 = scmp.ge.s32.totalorder %s1323_s21, 2  ;;  %s988_s9 = sand.u32 1, %s1311_s18  }
 0x5c8   : > { %s989_s16 = scalar_lea.sflag [#allocation4], %s988_s9 }
 0x5c9   : > { %p1184_p2 = pnand %p1187_p1, %p1404_p6 }
 0x5cb   : > { %1306 = dma.done.wait (!%p1184_p2), %s989_s16, 128  }
 0x5cc   : > { %1308 = vsyncadd (!%p1184_p2), %s989_s16, 4294967168  ;;  %p15_p3 = scmp.ge.s32.totalorder %s1387_s24, 4   ;;  %s1596_s18 = smov %s1315_s19 }
 0x5cd   : > { %s1597_s19 = smov %s1319_s20  ;;  %s1598_s20 = smov %s1398_s27 }
 0x5ce   : > { %s1599_s21 = smov %s1387_s24  ;;  %17 = sbr.rel (!%p15_p3) target bundleno = 3 (0x3), region = 75 }
 0x5d5   :  { %994 = vsyncpa [#allocation4], 1 }
 0x5d6   :  { %996 = vsyncpa [#allocation4 + $0x1], 1 }

</bundles_post_ra>
